<compile_context>
chip_gen: v6e
topology: v6e:2x2x1
jax: 0.10.0
libtpu: 0.0.40
codegen_flags: <defaults>
</compile_context>

<pallas_src>
import numpy as np
import jax
import jax.numpy as jnp
from jax import lax
from jax.experimental import pallas as pl
from jax.experimental.pallas import tpu as pltpu

_SQRT_HALF = 0.7071067811865476


def _erf_approx(x):
    # Abramowitz & Stegun 7.1.26, |err| <= 1.5e-7.  Only uses mul/add/div/exp,
    # which all lower cleanly in Mosaic (exp runs on the EUP slot).
    p = 0.3275911
    a1, a2, a3, a4, a5 = (0.254829592, -0.284496736, 1.421413741,
                          -1.453152027, 1.061405429)
    ax = jnp.abs(x)
    t = 1.0 / (1.0 + p * ax)
    poly = ((((a5 * t + a4) * t + a3) * t + a2) * t + a1) * t
    e = 1.0 - poly * jnp.exp(-ax * ax)
    return jnp.where(x >= 0, e, -e)


def _gelu(x):
    # exact (erf-based) GELU, matching PyTorch nn.GELU() default
    return 0.5 * x * (1.0 + _erf_approx(x * _SQRT_HALF))


# --------------------------- Pallas kernel -----------------------------------

def _make_mlp_kernel(H, W):
    KH = KW = 3

    def kernel(x_ref, w1_ref, b1_ref, bn1_ref, wd_ref, bd_ref, bn2_ref,
               w2_ref, b2_ref, o_ref, pad_ref):
        c_hid = w1_ref.shape[1]
        n = x_ref.shape[1]

        # ---- conv1: 1x1 conv == channel matmul (MXU) + bias, GELU, BN1 ------
        x = x_ref[0]                                           # (N, Cin)
        h = jnp.dot(x, w1_ref[...], preferred_element_type=jnp.float32)
        h = h + b1_ref[...]                                    # (1, Chid) bcast
        h = _gelu(h)
        a = h * bn1_ref[0:1, :] + bn1_ref[1:2, :]              # BN1 scale/shift
        a3 = a.reshape(H, W, c_hid)                            # channels-last

        # ---- proj: 3x3 depthwise conv (pad=1) + bias + residual -------------
        # zero-padded activation lives in VMEM scratch; each tap is a static
        # sublane-axis shifted slice times a lane-dense (1, Chid) weight row.
        pad_ref[...] = jnp.zeros_like(pad_ref)
        pad_ref[1:H + 1, 1:W + 1, :] = a3
        acc = a3 + bd_ref[...]                                 # residual + bias
        for k in range(KH * KW):
            dh, dw = k // KW, k % KW
            acc = acc + pad_ref[dh:dh + H, dw:dw + W, :] * wd_ref[k:k + 1, :]

        # ---- GELU, BN2 -------------------------------------------------------
        y = _gelu(acc)
        y = y * bn2_ref[0:1, :] + bn2_ref[1:2, :]
        y2 = y.reshape(n, c_hid)

        # ---- conv2: 1x1 conv (BN3 folded into w2/b2 in the wrapper) ----------
        out = jnp.dot(y2, w2_ref[...], preferred_element_type=jnp.float32)
        o_ref[0] = out + b2_ref[...]

    return kernel


# ------------------------------ wrapper ---------------------------------------

def mlp_forward(x, params, H, W):
    """x: (B, N, Cin) float32, N == H*W.  Returns (B, N, Cout)."""
    B, N, Cin = x.shape
    assert N == H * W
    eps = 1e-5

    w1, b1 = params["w1"], params["b1"]
    g1, beta1, m1, v1 = params["bn1"]
    wd, bd = params["wd"], params["bd"]
    g2, beta2, m2, v2 = params["bn2"]
    w2, b2 = params["w2"], params["b2"]
    g3, beta3, m3, v3 = params["bn3"]

    Chid = w1.shape[1]
    Cout = w2.shape[1]

    # Fold BatchNorms (inference) to per-channel scale/shift; fold BN3 into conv2.
    s1 = g1 / jnp.sqrt(v1 + eps)
    t1 = beta1 - m1 * s1
    s2 = g2 / jnp.sqrt(v2 + eps)
    t2 = beta2 - m2 * s2
    s3 = g3 / jnp.sqrt(v3 + eps)
    w2f = w2 * s3[None, :]
    b2f = (b2 - m3) * s3 + beta3

    bn1 = jnp.stack([s1, t1], axis=0)            # (2, Chid)
    bn2 = jnp.stack([s2, t2], axis=0)            # (2, Chid)
    wd_flat = wd.reshape(9, Chid)                # 3x3 taps, lane-dense
    b1r = b1.reshape(1, Chid)
    bdr = bd.reshape(1, Chid)
    b2r = b2f.reshape(1, Cout)

    kernel = _make_mlp_kernel(H, W)
    out = pl.pallas_call(
        kernel,
        out_shape=jax.ShapeDtypeStruct((B, N, Cout), jnp.float32),
        grid=(B,),
        in_specs=[
            pl.BlockSpec((1, N, Cin), lambda b: (b, 0, 0)),    # x
            pl.BlockSpec((Cin, Chid), lambda b: (0, 0)),       # w1
            pl.BlockSpec((1, Chid), lambda b: (0, 0)),         # b1
            pl.BlockSpec((2, Chid), lambda b: (0, 0)),         # BN1 scale/shift
            pl.BlockSpec((9, Chid), lambda b: (0, 0)),         # depthwise taps
            pl.BlockSpec((1, Chid), lambda b: (0, 0)),         # depthwise bias
            pl.BlockSpec((2, Chid), lambda b: (0, 0)),         # BN2 scale/shift
            pl.BlockSpec((Chid, Cout), lambda b: (0, 0)),      # w2 (BN3 folded)
            pl.BlockSpec((1, Cout), lambda b: (0, 0)),         # b2 (BN3 folded)
        ],
        out_specs=pl.BlockSpec((1, N, Cout), lambda b: (b, 0, 0)),
        scratch_shapes=[pltpu.VMEM((H + 2, W + 2, Chid), jnp.float32)],
        compiler_params=pltpu.CompilerParams(
            dimension_semantics=("parallel",)),
    )(x, w1, b1r, bn1, wd_flat, bdr, bn2, w2f, b2r)
    return out


# ----------------------- pure-JAX reference (for checking) --------------------

def _ref_forward(x, params, H, W):
    B, N, Cin = x.shape
    eps = 1e-5
    w1, b1 = params["w1"], params["b1"]
    g1, beta1, m1, v1 = params["bn1"]
    wd, bd = params["wd"], params["bd"]
    g2, beta2, m2, v2 = params["bn2"]
    w2, b2 = params["w2"], params["b2"]
    g3, beta3, m3, v3 = params["bn3"]
    Chid = w1.shape[1]

    def bn(z, g, beta, m, v):
        return (z - m) * (g / jnp.sqrt(v + eps)) + beta

    gelu = lambda z: jax.nn.gelu(z, approximate=False)

    h = jnp.einsum("bnc,ch->bnh", x, w1,
                   precision=lax.Precision.HIGHEST) + b1
    h = bn(gelu(h), g1, beta1, m1, v1)
    a = h.reshape(B, H, W, Chid)
    k = wd.reshape(3, 3, 1, Chid)
    d = lax.conv_general_dilated(
        a, k, (1, 1), [(1, 1), (1, 1)],
        dimension_numbers=("NHWC", "HWIO", "NHWC"),
        feature_group_count=Chid,
        precision=lax.Precision.HIGHEST)
    y = bn(gelu(d + bd + a), g2, beta2, m2, v2)
    y = y.reshape(B, N, Chid)
    out = jnp.einsum("bnh,ho->bno", y, w2,
                     precision=lax.Precision.HIGHEST) + b2
    out = bn(out, g3, beta3, m3, v3)
    return out


# --------------------------------- main ----------------------------------------

if __name__ == "__main__":
    B, H, W = 2, 8, 8
    N = H * W
    Cin, Chid, Cout = 64, 128, 64     # hidden = 128 -> fully lane-dense middle stage

    ks = jax.random.split(jax.random.PRNGKey(0), 20)
    x = jax.random.normal(ks[0], (B, N, Cin), jnp.float32)

    params = dict(
        w1=jax.random.normal(ks[1], (Cin, Chid), jnp.float32) * 0.1,
        b1=jax.random.normal(ks[2], (Chid,), jnp.float32) * 0.1,
        bn1=(1.0 + 0.1 * jax.random.normal(ks[3], (Chid,), jnp.float32),
             0.1 * jax.random.normal(ks[4], (Chid,), jnp.float32),
             0.1 * jax.random.normal(ks[5], (Chid,), jnp.float32),
             0.5 + jax.random.uniform(ks[6], (Chid,), jnp.float32)),
        wd=jax.random.normal(ks[7], (3, 3, Chid), jnp.float32) * 0.1,
        bd=jax.random.normal(ks[8], (Chid,), jnp.float32) * 0.1,
        bn2=(1.0 + 0.1 * jax.random.normal(ks[9], (Chid,), jnp.float32),
             0.1 * jax.random.normal(ks[10], (Chid,), jnp.float32),
             0.1 * jax.random.normal(ks[11], (Chid,), jnp.float32),
             0.5 + jax.random.uniform(ks[12], (Chid,), jnp.float32)),
        w2=jax.random.normal(ks[13], (Chid, Cout), jnp.float32) * 0.1,
        b2=jax.random.normal(ks[14], (Cout,), jnp.float32) * 0.1,
        bn3=(1.0 + 0.1 * jax.random.normal(ks[15], (Cout,), jnp.float32),
             0.1 * jax.random.normal(ks[16], (Cout,), jnp.float32),
             0.1 * jax.random.normal(ks[17], (Cout,), jnp.float32),
             0.5 + jax.random.uniform(ks[18], (Cout,), jnp.float32)),
    )

    y = jax.block_until_ready(mlp_forward(x, params, H, W))
    y_ref = jax.block_until_ready(_ref_forward(x, params, H, W))

    assert y.shape == (B, N, Cout)
    np.testing.assert_allclose(np.asarray(y), np.asarray(y_ref),
                               rtol=5e-3, atol=5e-3)
    print("KERNEL_OK")
</pallas_src>

<mosaic_0001>
module attributes {stable_mosaic.version = 11 : i64} {
  func.func @kernel(%arg0: i32, %arg1: memref<1x64x64xf32, #tpu.memory_space<vmem>>, %arg2: memref<64x128xf32, #tpu.memory_space<vmem>>, %arg3: memref<1x128xf32, #tpu.memory_space<vmem>>, %arg4: memref<2x128xf32, #tpu.memory_space<vmem>>, %arg5: memref<9x128xf32, #tpu.memory_space<vmem>>, %arg6: memref<1x128xf32, #tpu.memory_space<vmem>>, %arg7: memref<2x128xf32, #tpu.memory_space<vmem>>, %arg8: memref<128x64xf32, #tpu.memory_space<vmem>>, %arg9: memref<1x64xf32, #tpu.memory_space<vmem>>, %arg10: memref<1x64x64xf32, #tpu.memory_space<vmem>>, %arg11: memref<10x10x128xf32, #tpu.memory_space<vmem>>) attributes {dimension_semantics = [#tpu.dimension_semantics<parallel>], iteration_bounds = array<i64: 2>, scalar_prefetch = 0 : i64, scratch_operands = 1 : i64, tpu.core_type = #tpu.core_type<tc>, window_params = [{transform_indices = @transform_0, window_bounds = array<i64: 1, 64, 64>}, {pipeline_mode = #tpu.pipeline_mode<synchronous>, transform_indices = @transform_1, window_bounds = array<i64: 64, 128>}, {pipeline_mode = #tpu.pipeline_mode<synchronous>, transform_indices = @transform_2, window_bounds = array<i64: 1, 128>}, {pipeline_mode = #tpu.pipeline_mode<synchronous>, transform_indices = @transform_3, window_bounds = array<i64: 2, 128>}, {pipeline_mode = #tpu.pipeline_mode<synchronous>, transform_indices = @transform_4, window_bounds = array<i64: 9, 128>}, {pipeline_mode = #tpu.pipeline_mode<synchronous>, transform_indices = @transform_5, window_bounds = array<i64: 1, 128>}, {pipeline_mode = #tpu.pipeline_mode<synchronous>, transform_indices = @transform_6, window_bounds = array<i64: 2, 128>}, {pipeline_mode = #tpu.pipeline_mode<synchronous>, transform_indices = @transform_7, window_bounds = array<i64: 128, 64>}, {pipeline_mode = #tpu.pipeline_mode<synchronous>, transform_indices = @transform_8, window_bounds = array<i64: 1, 64>}, {transform_indices = @transform_9, window_bounds = array<i64: 1, 64, 64>}]} {
    %c0 = arith.constant 0 : index
    %c0_0 = arith.constant 0 : index
    %c0_1 = arith.constant 0 : index
    %0 = vector.load %arg1[%c0, %c0_0, %c0_1] : memref<1x64x64xf32, #tpu.memory_space<vmem>>, vector<1x64x64xf32>
    %1 = vector.shape_cast %0 : vector<1x64x64xf32> to vector<64x64xf32>
    %c0_2 = arith.constant 0 : index
    %c0_3 = arith.constant 0 : index
    %2 = vector.load %arg2[%c0_2, %c0_3] : memref<64x128xf32, #tpu.memory_space<vmem>>, vector<64x128xf32>
    %cst = arith.constant dense<0.000000e+00> : vector<64x128xf32>
    %3 = tpu.matmul %1, %2, %cst {dimension_numbers = #tpu.dot_dimension_numbers<[1], [0], [0], [1], [0, 0, 1, 1], [], []>} : vector<64x64xf32>, vector<64x128xf32>, vector<64x128xf32> -> vector<64x128xf32>
    %c0_4 = arith.constant 0 : index
    %c0_5 = arith.constant 0 : index
    %4 = vector.load %arg3[%c0_4, %c0_5] : memref<1x128xf32, #tpu.memory_space<vmem>>, vector<1x128xf32>
    %5 = vector.broadcast %4 : vector<1x128xf32> to vector<64x128xf32>
    %6 = arith.addf %3, %5 : vector<64x128xf32>
    %cst_6 = arith.constant 5.000000e-01 : f32
    %7 = vector.broadcast %cst_6 : f32 to vector<64x128xf32>
    %8 = arith.mulf %7, %6 : vector<64x128xf32>
    %cst_7 = arith.constant 0.707106769 : f32
    %9 = vector.broadcast %cst_7 : f32 to vector<64x128xf32>
    %10 = arith.mulf %6, %9 : vector<64x128xf32>
    %11 = math.absf %10 : vector<64x128xf32>
    %cst_8 = arith.constant 0.327591091 : f32
    %12 = vector.broadcast %cst_8 : f32 to vector<64x128xf32>
    %13 = arith.mulf %12, %11 : vector<64x128xf32>
    %cst_9 = arith.constant 1.000000e+00 : f32
    %14 = vector.broadcast %cst_9 : f32 to vector<64x128xf32>
    %15 = arith.addf %14, %13 : vector<64x128xf32>
    %cst_10 = arith.constant 1.000000e+00 : f32
    %16 = vector.broadcast %cst_10 : f32 to vector<64x128xf32>
    %17 = arith.divf %16, %15 : vector<64x128xf32>
    %cst_11 = arith.constant 1.06140542 : f32
    %18 = vector.broadcast %cst_11 : f32 to vector<64x128xf32>
    %19 = arith.mulf %18, %17 : vector<64x128xf32>
    %cst_12 = arith.constant -1.45315206 : f32
    %20 = vector.broadcast %cst_12 : f32 to vector<64x128xf32>
    %21 = arith.addf %19, %20 : vector<64x128xf32>
    %22 = arith.mulf %21, %17 : vector<64x128xf32>
    %cst_13 = arith.constant 1.42141378 : f32
    %23 = vector.broadcast %cst_13 : f32 to vector<64x128xf32>
    %24 = arith.addf %22, %23 : vector<64x128xf32>
    %25 = arith.mulf %24, %17 : vector<64x128xf32>
    %cst_14 = arith.constant -0.284496725 : f32
    %26 = vector.broadcast %cst_14 : f32 to vector<64x128xf32>
    %27 = arith.addf %25, %26 : vector<64x128xf32>
    %28 = arith.mulf %27, %17 : vector<64x128xf32>
    %cst_15 = arith.constant 0.254829586 : f32
    %29 = vector.broadcast %cst_15 : f32 to vector<64x128xf32>
    %30 = arith.addf %28, %29 : vector<64x128xf32>
    %31 = arith.mulf %30, %17 : vector<64x128xf32>
    %cst_16 = arith.constant 0.000000e+00 : f32
    %32 = vector.broadcast %cst_16 : f32 to vector<64x128xf32>
    %33 = arith.subf %32, %11 : vector<64x128xf32>
    %34 = arith.mulf %33, %11 : vector<64x128xf32>
    %35 = math.exp %34 : vector<64x128xf32>
    %36 = arith.mulf %31, %35 : vector<64x128xf32>
    %cst_17 = arith.constant 1.000000e+00 : f32
    %37 = vector.broadcast %cst_17 : f32 to vector<64x128xf32>
    %38 = arith.subf %37, %36 : vector<64x128xf32>
    %cst_18 = arith.constant 0.000000e+00 : f32
    %39 = vector.broadcast %cst_18 : f32 to vector<64x128xf32>
    %40 = arith.cmpf oge, %10, %39 : vector<64x128xf32>
    %cst_19 = arith.constant 0.000000e+00 : f32
    %41 = vector.broadcast %cst_19 : f32 to vector<64x128xf32>
    %42 = arith.subf %41, %38 : vector<64x128xf32>
    %43 = arith.select %40, %38, %42 : vector<64x128xi1>, vector<64x128xf32>
    %cst_20 = arith.constant 1.000000e+00 : f32
    %44 = vector.broadcast %cst_20 : f32 to vector<64x128xf32>
    %45 = arith.addf %44, %43 : vector<64x128xf32>
    %46 = arith.mulf %8, %45 : vector<64x128xf32>
    %c0_21 = arith.constant 0 : index
    %c0_22 = arith.constant 0 : index
    %47 = vector.load %arg4[%c0_21, %c0_22] : memref<2x128xf32, #tpu.memory_space<vmem>>, vector<1x128xf32>
    %48 = vector.broadcast %47 : vector<1x128xf32> to vector<64x128xf32>
    %49 = arith.mulf %46, %48 : vector<64x128xf32>
    %c1 = arith.constant 1 : index
    %c0_23 = arith.constant 0 : index
    %50 = vector.load %arg4[%c1, %c0_23] : memref<2x128xf32, #tpu.memory_space<vmem>>, vector<1x128xf32>
    %51 = vector.broadcast %50 : vector<1x128xf32> to vector<64x128xf32>
    %52 = arith.addf %49, %51 : vector<64x128xf32>
    %53 = vector.shape_cast %52 : vector<64x128xf32> to vector<8x8x128xf32>
    %cst_24 = arith.constant 0.000000e+00 : f32
    %54 = vector.broadcast %cst_24 : f32 to vector<10x10x128xf32>
    %c0_25 = arith.constant 0 : index
    %c0_26 = arith.constant 0 : index
    %c0_27 = arith.constant 0 : index
    %55 = vector.load %arg11[%c0_25, %c0_26, %c0_27] : memref<10x10x128xf32, #tpu.memory_space<vmem>>, vector<10x10x128xf32>
    tpu.vector_store %arg11[%c0_25, %c0_26, %c0_27], %54 {strides = array<i32>} : memref<10x10x128xf32, #tpu.memory_space<vmem>>, vector<10x10x128xf32>,
    %c1_28 = arith.constant 1 : index
    %c1_29 = arith.constant 1 : index
    %c0_30 = arith.constant 0 : index
    %56 = vector.load %arg11[%c1_28, %c1_29, %c0_30] : memref<10x10x128xf32, #tpu.memory_space<vmem>>, vector<8x8x128xf32>
    tpu.vector_store %arg11[%c1_28, %c1_29, %c0_30], %53 {strides = array<i32>} : memref<10x10x128xf32, #tpu.memory_space<vmem>>, vector<8x8x128xf32>,
    %c0_31 = arith.constant 0 : index
    %c0_32 = arith.constant 0 : index
    %57 = vector.load %arg6[%c0_31, %c0_32] : memref<1x128xf32, #tpu.memory_space<vmem>>, vector<1x128xf32>
    %58 = vector.shape_cast %57 : vector<1x128xf32> to vector<1x1x128xf32>
    %59 = vector.broadcast %58 : vector<1x1x128xf32> to vector<8x8x128xf32>
    %60 = arith.addf %53, %59 : vector<8x8x128xf32>
    %c0_33 = arith.constant 0 : index
    %c0_34 = arith.constant 0 : index
    %c0_35 = arith.constant 0 : index
    %61 = vector.load %arg11[%c0_33, %c0_34, %c0_35] : memref<10x10x128xf32, #tpu.memory_space<vmem>>, vector<8x8x128xf32>
    %c0_36 = arith.constant 0 : index
    %c0_37 = arith.constant 0 : index
    %62 = vector.load %arg5[%c0_36, %c0_37] : memref<9x128xf32, #tpu.memory_space<vmem>>, vector<1x128xf32>
    %63 = vector.shape_cast %62 : vector<1x128xf32> to vector<1x1x128xf32>
    %64 = vector.broadcast %63 : vector<1x1x128xf32> to vector<8x8x128xf32>
    %65 = arith.mulf %61, %64 : vector<8x8x128xf32>
    %66 = arith.addf %60, %65 : vector<8x8x128xf32>
    %c0_38 = arith.constant 0 : index
    %c1_39 = arith.constant 1 : index
    %c0_40 = arith.constant 0 : index
    %67 = vector.load %arg11[%c0_38, %c1_39, %c0_40] : memref<10x10x128xf32, #tpu.memory_space<vmem>>, vector<8x8x128xf32>
    %c1_41 = arith.constant 1 : index
    %c0_42 = arith.constant 0 : index
    %68 = vector.load %arg5[%c1_41, %c0_42] : memref<9x128xf32, #tpu.memory_space<vmem>>, vector<1x128xf32>
    %69 = vector.shape_cast %68 : vector<1x128xf32> to vector<1x1x128xf32>
    %70 = vector.broadcast %69 : vector<1x1x128xf32> to vector<8x8x128xf32>
    %71 = arith.mulf %67, %70 : vector<8x8x128xf32>
    %72 = arith.addf %66, %71 : vector<8x8x128xf32>
    %c0_43 = arith.constant 0 : index
    %c2 = arith.constant 2 : index
    %c0_44 = arith.constant 0 : index
    %73 = vector.load %arg11[%c0_43, %c2, %c0_44] : memref<10x10x128xf32, #tpu.memory_space<vmem>>, vector<8x8x128xf32>
    %c2_45 = arith.constant 2 : index
    %c0_46 = arith.constant 0 : index
    %74 = vector.load %arg5[%c2_45, %c0_46] : memref<9x128xf32, #tpu.memory_space<vmem>>, vector<1x128xf32>
    %75 = vector.shape_cast %74 : vector<1x128xf32> to vector<1x1x128xf32>
    %76 = vector.broadcast %75 : vector<1x1x128xf32> to vector<8x8x128xf32>
    %77 = arith.mulf %73, %76 : vector<8x8x128xf32>
    %78 = arith.addf %72, %77 : vector<8x8x128xf32>
    %c1_47 = arith.constant 1 : index
    %c0_48 = arith.constant 0 : index
    %c0_49 = arith.constant 0 : index
    %79 = vector.load %arg11[%c1_47, %c0_48, %c0_49] : memref<10x10x128xf32, #tpu.memory_space<vmem>>, vector<8x8x128xf32>
    %c3 = arith.constant 3 : index
    %c0_50 = arith.constant 0 : index
    %80 = vector.load %arg5[%c3, %c0_50] : memref<9x128xf32, #tpu.memory_space<vmem>>, vector<1x128xf32>
    %81 = vector.shape_cast %80 : vector<1x128xf32> to vector<1x1x128xf32>
    %82 = vector.broadcast %81 : vector<1x1x128xf32> to vector<8x8x128xf32>
    %83 = arith.mulf %79, %82 : vector<8x8x128xf32>
    %84 = arith.addf %78, %83 : vector<8x8x128xf32>
    %c1_51 = arith.constant 1 : index
    %c1_52 = arith.constant 1 : index
    %c0_53 = arith.constant 0 : index
    %85 = vector.load %arg11[%c1_51, %c1_52, %c0_53] : memref<10x10x128xf32, #tpu.memory_space<vmem>>, vector<8x8x128xf32>
    %c4 = arith.constant 4 : index
    %c0_54 = arith.constant 0 : index
    %86 = vector.load %arg5[%c4, %c0_54] : memref<9x128xf32, #tpu.memory_space<vmem>>, vector<1x128xf32>
    %87 = vector.shape_cast %86 : vector<1x128xf32> to vector<1x1x128xf32>
    %88 = vector.broadcast %87 : vector<1x1x128xf32> to vector<8x8x128xf32>
    %89 = arith.mulf %85, %88 : vector<8x8x128xf32>
    %90 = arith.addf %84, %89 : vector<8x8x128xf32>
    %c1_55 = arith.constant 1 : index
    %c2_56 = arith.constant 2 : index
    %c0_57 = arith.constant 0 : index
    %91 = vector.load %arg11[%c1_55, %c2_56, %c0_57] : memref<10x10x128xf32, #tpu.memory_space<vmem>>, vector<8x8x128xf32>
    %c5 = arith.constant 5 : index
    %c0_58 = arith.constant 0 : index
    %92 = vector.load %arg5[%c5, %c0_58] : memref<9x128xf32, #tpu.memory_space<vmem>>, vector<1x128xf32>
    %93 = vector.shape_cast %92 : vector<1x128xf32> to vector<1x1x128xf32>
    %94 = vector.broadcast %93 : vector<1x1x128xf32> to vector<8x8x128xf32>
    %95 = arith.mulf %91, %94 : vector<8x8x128xf32>
    %96 = arith.addf %90, %95 : vector<8x8x128xf32>
    %c2_59 = arith.constant 2 : index
    %c0_60 = arith.constant 0 : index
    %c0_61 = arith.constant 0 : index
    %97 = vector.load %arg11[%c2_59, %c0_60, %c0_61] : memref<10x10x128xf32, #tpu.memory_space<vmem>>, vector<8x8x128xf32>
    %c6 = arith.constant 6 : index
    %c0_62 = arith.constant 0 : index
    %98 = vector.load %arg5[%c6, %c0_62] : memref<9x128xf32, #tpu.memory_space<vmem>>, vector<1x128xf32>
    %99 = vector.shape_cast %98 : vector<1x128xf32> to vector<1x1x128xf32>
    %100 = vector.broadcast %99 : vector<1x1x128xf32> to vector<8x8x128xf32>
    %101 = arith.mulf %97, %100 : vector<8x8x128xf32>
    %102 = arith.addf %96, %101 : vector<8x8x128xf32>
    %c2_63 = arith.constant 2 : index
    %c1_64 = arith.constant 1 : index
    %c0_65 = arith.constant 0 : index
    %103 = vector.load %arg11[%c2_63, %c1_64, %c0_65] : memref<10x10x128xf32, #tpu.memory_space<vmem>>, vector<8x8x128xf32>
    %c7 = arith.constant 7 : index
    %c0_66 = arith.constant 0 : index
    %104 = vector.load %arg5[%c7, %c0_66] : memref<9x128xf32, #tpu.memory_space<vmem>>, vector<1x128xf32>
    %105 = vector.shape_cast %104 : vector<1x128xf32> to vector<1x1x128xf32>
    %106 = vector.broadcast %105 : vector<1x1x128xf32> to vector<8x8x128xf32>
    %107 = arith.mulf %103, %106 : vector<8x8x128xf32>
    %108 = arith.addf %102, %107 : vector<8x8x128xf32>
    %c2_67 = arith.constant 2 : index
    %c2_68 = arith.constant 2 : index
    %c0_69 = arith.constant 0 : index
    %109 = vector.load %arg11[%c2_67, %c2_68, %c0_69] : memref<10x10x128xf32, #tpu.memory_space<vmem>>, vector<8x8x128xf32>
    %c8 = arith.constant 8 : index
    %c0_70 = arith.constant 0 : index
    %110 = vector.load %arg5[%c8, %c0_70] : memref<9x128xf32, #tpu.memory_space<vmem>>, vector<1x128xf32>
    %111 = vector.shape_cast %110 : vector<1x128xf32> to vector<1x1x128xf32>
    %112 = vector.broadcast %111 : vector<1x1x128xf32> to vector<8x8x128xf32>
    %113 = arith.mulf %109, %112 : vector<8x8x128xf32>
    %114 = arith.addf %108, %113 : vector<8x8x128xf32>
    %cst_71 = arith.constant 5.000000e-01 : f32
    %115 = vector.broadcast %cst_71 : f32 to vector<8x8x128xf32>
    %116 = arith.mulf %115, %114 : vector<8x8x128xf32>
    %cst_72 = arith.constant 0.707106769 : f32
    %117 = vector.broadcast %cst_72 : f32 to vector<8x8x128xf32>
    %118 = arith.mulf %114, %117 : vector<8x8x128xf32>
    %119 = math.absf %118 : vector<8x8x128xf32>
    %cst_73 = arith.constant 0.327591091 : f32
    %120 = vector.broadcast %cst_73 : f32 to vector<8x8x128xf32>
    %121 = arith.mulf %120, %119 : vector<8x8x128xf32>
    %cst_74 = arith.constant 1.000000e+00 : f32
    %122 = vector.broadcast %cst_74 : f32 to vector<8x8x128xf32>
    %123 = arith.addf %122, %121 : vector<8x8x128xf32>
    %cst_75 = arith.constant 1.000000e+00 : f32
    %124 = vector.broadcast %cst_75 : f32 to vector<8x8x128xf32>
    %125 = arith.divf %124, %123 : vector<8x8x128xf32>
    %cst_76 = arith.constant 1.06140542 : f32
    %126 = vector.broadcast %cst_76 : f32 to vector<8x8x128xf32>
    %127 = arith.mulf %126, %125 : vector<8x8x128xf32>
    %cst_77 = arith.constant -1.45315206 : f32
    %128 = vector.broadcast %cst_77 : f32 to vector<8x8x128xf32>
    %129 = arith.addf %127, %128 : vector<8x8x128xf32>
    %130 = arith.mulf %129, %125 : vector<8x8x128xf32>
    %cst_78 = arith.constant 1.42141378 : f32
    %131 = vector.broadcast %cst_78 : f32 to vector<8x8x128xf32>
    %132 = arith.addf %130, %131 : vector<8x8x128xf32>
    %133 = arith.mulf %132, %125 : vector<8x8x128xf32>
    %cst_79 = arith.constant -0.284496725 : f32
    %134 = vector.broadcast %cst_79 : f32 to vector<8x8x128xf32>
    %135 = arith.addf %133, %134 : vector<8x8x128xf32>
    %136 = arith.mulf %135, %125 : vector<8x8x128xf32>
    %cst_80 = arith.constant 0.254829586 : f32
    %137 = vector.broadcast %cst_80 : f32 to vector<8x8x128xf32>
    %138 = arith.addf %136, %137 : vector<8x8x128xf32>
    %139 = arith.mulf %138, %125 : vector<8x8x128xf32>
    %cst_81 = arith.constant 0.000000e+00 : f32
    %140 = vector.broadcast %cst_81 : f32 to vector<8x8x128xf32>
    %141 = arith.subf %140, %119 : vector<8x8x128xf32>
    %142 = arith.mulf %141, %119 : vector<8x8x128xf32>
    %143 = math.exp %142 : vector<8x8x128xf32>
    %144 = arith.mulf %139, %143 : vector<8x8x128xf32>
    %cst_82 = arith.constant 1.000000e+00 : f32
    %145 = vector.broadcast %cst_82 : f32 to vector<8x8x128xf32>
    %146 = arith.subf %145, %144 : vector<8x8x128xf32>
    %cst_83 = arith.constant 0.000000e+00 : f32
    %147 = vector.broadcast %cst_83 : f32 to vector<8x8x128xf32>
    %148 = arith.cmpf oge, %118, %147 : vector<8x8x128xf32>
    %cst_84 = arith.constant 0.000000e+00 : f32
    %149 = vector.broadcast %cst_84 : f32 to vector<8x8x128xf32>
    %150 = arith.subf %149, %146 : vector<8x8x128xf32>
    %151 = arith.select %148, %146, %150 : vector<8x8x128xi1>, vector<8x8x128xf32>
    %cst_85 = arith.constant 1.000000e+00 : f32
    %152 = vector.broadcast %cst_85 : f32 to vector<8x8x128xf32>
    %153 = arith.addf %152, %151 : vector<8x8x128xf32>
    %154 = arith.mulf %116, %153 : vector<8x8x128xf32>
    %c0_86 = arith.constant 0 : index
    %c0_87 = arith.constant 0 : index
    %155 = vector.load %arg7[%c0_86, %c0_87] : memref<2x128xf32, #tpu.memory_space<vmem>>, vector<1x128xf32>
    %156 = vector.shape_cast %155 : vector<1x128xf32> to vector<1x1x128xf32>
    %157 = vector.broadcast %156 : vector<1x1x128xf32> to vector<8x8x128xf32>
    %158 = arith.mulf %154, %157 : vector<8x8x128xf32>
    %c1_88 = arith.constant 1 : index
    %c0_89 = arith.constant 0 : index
    %159 = vector.load %arg7[%c1_88, %c0_89] : memref<2x128xf32, #tpu.memory_space<vmem>>, vector<1x128xf32>
    %160 = vector.shape_cast %159 : vector<1x128xf32> to vector<1x1x128xf32>
    %161 = vector.broadcast %160 : vector<1x1x128xf32> to vector<8x8x128xf32>
    %162 = arith.addf %158, %161 : vector<8x8x128xf32>
    %163 = vector.shape_cast %162 : vector<8x8x128xf32> to vector<64x128xf32>
    %c0_90 = arith.constant 0 : index
    %c0_91 = arith.constant 0 : index
    %164 = vector.load %arg8[%c0_90, %c0_91] : memref<128x64xf32, #tpu.memory_space<vmem>>, vector<128x64xf32>
    %cst_92 = arith.constant dense<0.000000e+00> : vector<64x64xf32>
    %165 = tpu.matmul %163, %164, %cst_92 {dimension_numbers = #tpu.dot_dimension_numbers<[1], [0], [0], [1], [0, 0, 1, 1], [], []>} : vector<64x128xf32>, vector<128x64xf32>, vector<64x64xf32> -> vector<64x64xf32>
    %c0_93 = arith.constant 0 : index
    %c0_94 = arith.constant 0 : index
    %166 = vector.load %arg9[%c0_93, %c0_94] : memref<1x64xf32, #tpu.memory_space<vmem>>, vector<1x64xf32>
    %167 = vector.broadcast %166 : vector<1x64xf32> to vector<64x64xf32>
    %168 = arith.addf %165, %167 : vector<64x64xf32>
    %c0_95 = arith.constant 0 : index
    %c0_96 = arith.constant 0 : index
    %c0_97 = arith.constant 0 : index
    %169 = vector.load %arg10[%c0_95, %c0_96, %c0_97] : memref<1x64x64xf32, #tpu.memory_space<vmem>>, vector<1x64x64xf32>
    %170 = vector.shape_cast %169 : vector<1x64x64xf32> to vector<64x64xf32>
    %171 = vector.shape_cast %168 : vector<64x64xf32> to vector<1x64x64xf32>
    tpu.vector_store %arg10[%c0_95, %c0_96, %c0_97], %171 {strides = array<i32>} : memref<1x64x64xf32, #tpu.memory_space<vmem>>, vector<1x64x64xf32>,
    return
  }
  func.func @transform_0(%arg0: i32) -> (i32, i32, i32) {
    %c0_i32 = arith.constant 0 : i32
    %c0_i32_0 = arith.constant 0 : i32
    %c0_i32_1 = arith.constant 0 : i32
    return %arg0, %c0_i32, %c0_i32_0 : i32, i32, i32
  }
  func.func @transform_1(%arg0: i32) -> (i32, i32) {
    %c0_i32 = arith.constant 0 : i32
    %c0_i32_0 = arith.constant 0 : i32
    %c0_i32_1 = arith.constant 0 : i32
    return %c0_i32, %c0_i32_0 : i32, i32
  }
  func.func @transform_2(%arg0: i32) -> (i32, i32) {
    %c0_i32 = arith.constant 0 : i32
    %c0_i32_0 = arith.constant 0 : i32
    %c0_i32_1 = arith.constant 0 : i32
    return %c0_i32, %c0_i32_0 : i32, i32
  }
  func.func @transform_3(%arg0: i32) -> (i32, i32) {
    %c0_i32 = arith.constant 0 : i32
    %c0_i32_0 = arith.constant 0 : i32
    %c0_i32_1 = arith.constant 0 : i32
    return %c0_i32, %c0_i32_0 : i32, i32
  }
  func.func @transform_4(%arg0: i32) -> (i32, i32) {
    %c0_i32 = arith.constant 0 : i32
    %c0_i32_0 = arith.constant 0 : i32
    %c0_i32_1 = arith.constant 0 : i32
    return %c0_i32, %c0_i32_0 : i32, i32
  }
  func.func @transform_5(%arg0: i32) -> (i32, i32) {
    %c0_i32 = arith.constant 0 : i32
    %c0_i32_0 = arith.constant 0 : i32
    %c0_i32_1 = arith.constant 0 : i32
    return %c0_i32, %c0_i32_0 : i32, i32
  }
  func.func @transform_6(%arg0: i32) -> (i32, i32) {
    %c0_i32 = arith.constant 0 : i32
    %c0_i32_0 = arith.constant 0 : i32
    %c0_i32_1 = arith.constant 0 : i32
    return %c0_i32, %c0_i32_0 : i32, i32
  }
  func.func @transform_7(%arg0: i32) -> (i32, i32) {
    %c0_i32 = arith.constant 0 : i32
    %c0_i32_0 = arith.constant 0 : i32
    %c0_i32_1 = arith.constant 0 : i32
    return %c0_i32, %c0_i32_0 : i32, i32
  }
  func.func @transform_8(%arg0: i32) -> (i32, i32) {
    %c0_i32 = arith.constant 0 : i32
    %c0_i32_0 = arith.constant 0 : i32
    %c0_i32_1 = arith.constant 0 : i32
    return %c0_i32, %c0_i32_0 : i32, i32
  }
  func.func @transform_9(%arg0: i32) -> (i32, i32, i32) {
    %c0_i32 = arith.constant 0 : i32
    %c0_i32_0 = arith.constant 0 : i32
    %c0_i32_1 = arith.constant 0 : i32
    return %arg0, %c0_i32, %c0_i32_0 : i32, i32, i32
  }
}

</mosaic_0001>

<bundles_post_ra>
// kernel: tpu_custom_call.1
= control target key start
LH: loop header
LB: loop body
LE: loop exit
PB: predicated region body
PF: predicated region fallthrough
CT: control target
= control target key end

     0   :  { %14 = vsyncpa [#allocation4], 0  ;;  %s2688_s0 = inlined_call_operand.vmem [shape: f32[2,64,64], index: 0, kind: input, shape index: {}]   ;;  %s2689_s1 = inlined_call_operand.vmem [shape: f32[64,128], index: 1, kind: input, shape index: {}]   ;;  %s2690_s2 = inlined_call_operand.vmem [shape: f32[1,128], index: 2, kind: input, shape index: {}]   ;;  %s2691_s3 = inlined_call_operand.vmem [shape: f32[2,128], index: 3, kind: input, shape index: {}]   ;;  %s2692_s4 = inlined_call_operand.hbm [shape: f32[9,128], index: 4, kind: input, shape index: {}]   ;;  %s2693_s5 = inlined_call_operand.vmem [shape: f32[1,128], index: 5, kind: input, shape index: {}]   ;;  %s2694_s6 = inlined_call_operand.vmem [shape: f32[2,128], index: 6, kind: input, shape index: {}]   ;;  %s2695_s7 = inlined_call_operand.vmem [shape: f32[128,64], index: 7, kind: input, shape index: {}]   ;;  %s2696_s8 = inlined_call_operand.vmem [shape: f32[1,64], index: 8, kind: input, shape index: {}]   ;;  %s2697_s9 = inlined_call_operand.hbm [shape: f32[2,64,64], index: 9, kind: output, shape index: {}]  }
   0x1   :  { %15 = vsyncpa [#allocation5], 0 }
   0x2   :  { %17 = vsyncpa [#allocation5 + $0x1], 0  ;;  %s1933_s30 = smov 0   ;;  %s1935_s10 = smov 0  }
   0x3   :  { %s1937_s11 = smov 0   ;;  %s1939_s12 = smov 0  }
   0x4 LB: > { %s1954_s13 = sadd.s32 4294967295, %s1874_s12   ;;  %s1513_s14 = sadd.s32 4294967294, %s1874_s12   ;;  %s1874_s12 = sphi %s1939_s12, %s2705_s12   ;;  %s1870_s11 = sphi %s1937_s11, %s2704_s11   ;;  %s1866_s10 = sphi %s1935_s10, %s2703_s10   ;;  %s1862_s30 = sphi %s1933_s30, %s2702_s30  }
   0x5   : > { %s1958_s15 = sadd.s32 1, %s1874_s12   ;;  %s224_s16 = sadd.s32 1, %s1870_s11 }
   0x6   : > { %s221_s17 = ssub.s32 %s1874_s12, %s1958_s15  ;;  %p234_p0 = scmp.ne.s32.totalorder %s1870_s11, %s1866_s10 }
   0x7   : > { %p222_p1 = scmp.eq.s32.totalorder %s221_s17, 0  ;;  %p235_p2 = scmp.eq.s32.totalorder %s1954_s13, 1 }
   0x8   : > { %p240_p3 = scmp.ne.s32.totalorder %s1866_s10, %s1862_s30  ;;  %p241_p4 = scmp.eq.s32.totalorder %s1513_s14, 1 }
   0x9   : > { %s1969_s18 = scalar_select %p222_p1, %s1870_s11, %s224_s16  }
   0xa   : > { %p1971_p5 = por %p235_p2, %p234_p0  ;;  %p1975_p6 = por %p241_p4, %p240_p3 }
   0xb   : > { %p1514_p7 = scmp.ge.s32.totalorder %s1874_s12, 1  ;;  %p248_p8 = scmp.lt.s32.totalorder %s1874_s12, 3 }
   0xc   : > { %s2699_s20 = scalar_select %p1975_p6, 1, 0 }
   0xd   : > { %p1679_p9 = scmp.eq.s32.totalorder %s1954_s13, 0  ;;  %p1982_p10 = pnand %p1514_p7, %p248_p8 }
   0xe   : > { %s1876_s22 = smov [#allocation3]  }
   0xf   : > { %s269_s23 = sshll.u32 %s1876_s22, 4  ;;  %p1671_p11 = pneg %p1982_p10  ;;  %s270_s23 = int_to_ptr.vmem [resolvable:$true] %s269_s23 }
  0x10   : > { %s1795_s24 = scalar_lea.vmem %s270_s23, 256  ;;  %p1803_p3 = scmp.lt.s32.totalorder %s270_s23, %s270_s23 }
  0x11   : > { %p1672_p12 = pnand %p1679_p9, %p1671_p11  ;;  %p1796_p0 = scmp.ne.s32.totalorder %s270_s23, %s1795_s24 }
  0x12   : > { %p1804_p4 = scmp.lt.s32.totalorder %s1795_s24, %s1795_s24 }
  0x13   : > { %p1786_p13 = pneg %p1672_p12 }
  0x14   : > { %p1805_p6 = por %p1804_p4, %p1803_p3 }
  0x15   : > { %p1798_p1 = pnand %p1796_p0, %p1786_p13 }
  0x17   : > { %p1799_p2 = pneg %p1798_p1 }
  0x19   : > { %p1806_p7 = pnand %p1805_p6, %p1799_p2 }
  0x1b   : > { %1809 = shalt.err (!%p1806_p7)
}
  0x1c   : > { %s1877_s25 = smov 128   ;;  %s1878_s26 = smov 8  }
  0x1d   : > { %1674 = dma.hbm_to_vmem [thread:$0]  (!%p1672_p12), %s2692_s4, 256, %s270_s23, [#allocation4], %s1877_s25, %s1877_s25, %s1878_s26  }
  0x1e   : > { %305 = sbr.rel (%p1982_p10) target bundleno = 649 (0x289), region = 56 }
  0x23   : > { %1853 = dma.done.wait (%p1679_p9), [#allocation4], 256  }
  0x24   : > { %1855 = vsyncadd (%p1679_p9), [#allocation4], 4294967040  ;;  %p341_p8 = scmp.lt.s32.totalorder %s1954_s13, 1  ;;  %v361_v0 = vld [vmem:[%s2689_s1 + $0x38] sm:$0xff]  ;;  %v360_v1 = vld [vmem:[%s2689_s1 + $0x30] sm:$0xff]  ;;  %vm369_vm0 = vcmask 523264  }
  0x25   : > { %1593 = vmatprep.subr.mxu0 %v361_v0  ;;  %v359_v2 = vld [vmem:[%s2689_s1 + $0x28] sm:$0xff]  ;;  %v358_v4 = vld [vmem:[%s2689_s1 + $0x20] sm:$0xff]  ;;  %v357_v5 = vld [vmem:[%s2689_s1 + $0x18] sm:$0xff]  ;;  %v1879_v16 = vmov 0.0   ;;  %s338_s24 = sand.u32 1, %s1866_s10   ;;  %s1552_s27 = sshll.u32 %s1954_s13, 10 }
  0x26   : > { %s342_s29 = scalar_select %p341_p8, %s1954_s13, 1  ;;  %1594 = vmatpush3.msra.mxu0 %v361_v0  ;;  %v356_v6 = vld [vmem:[%s2689_s1 + $0x10] sm:$0xff]  ;;  %v355_v7 = vld [vmem:[%s2689_s1 + $0x8] sm:$0xff]  ;;  %v354_v8 = vld [vmem:[%s2689_s1] sm:$0xff]  ;;  %745 = vst [vmem:[#allocation2 + $0x20] sm:$0xff] %v1879_v16 }
  0x27   : > { %1595 = vmatprep.subr.mxu0 %v360_v1  ;;  %746 = vst [vmem:[#allocation2 + $0x28] sm:$0x3] %v1879_v16  ;;  %741 = vst [vmem:[#allocation2] sm:$0xff] %v1879_v16  ;;  %v1304_v17 = vld [vmem:[%s2695_s7 + $0x78] sm:$0xff]  ;;  %v1303_v18 = vld [vmem:[%s2695_s7 + $0x70] sm:$0xff]  ;;  %s1519_s21 = sshll.u32 %s338_s24, 6  ;;  %s2640_s16 = scalar_lea.hbm %s2697_s9, %s1552_s27 }
  0x28   : > { %s1551_s14 = sshll.u32 %s342_s29, 6  ;;  %1596 = vmatpush3.msra.mxu0 %v360_v1  ;;  %742 = vst [vmem:[#allocation2 + $0x8] sm:$0x3] %v1879_v16  ;;  %743 = vst [vmem:[#allocation2 + $0x10] sm:$0xff] %v1879_v16  ;;  %1621 = vmatprep.subr.mxu1 %v1304_v17  ;;  %v1302_v19 = vld [vmem:[%s2695_s7 + $0x68] sm:$0xff]  ;;  %v1301_v20 = vld [vmem:[%s2695_s7 + $0x60] sm:$0xff] }
  0x29   : > { %s2004_s22 = scalar_lea.vmem %s2688_s0, %s1551_s14  ;;  %1597 = vmatprep.subr.mxu0 %v359_v2  ;;  %744 = vst [vmem:[#allocation2 + $0x18] sm:$0x3] %v1879_v16  ;;  %747 = vst [vmem:[#allocation2 + $0x30] sm:$0xff] %v1879_v16  ;;  %1622 = vmatpush3.msra.mxu1 %v1304_v17  ;;  %v1300_v21 = vld [vmem:[%s2695_s7 + $0x58] sm:$0xff]  ;;  %v1299_v22 = vld [vmem:[%s2695_s7 + $0x50] sm:$0xff]  ;;  %s2648_s13 = scalar_lea.sflag [#allocation5], %s338_s24 }
  0x2a   : > { %v346_v3 = vld [vmem:[%s2004_s22] sm:$0xff]  ;;  %1598 = vmatpush3.msra.mxu0 %v359_v2  ;;  %v347_v9 = vld [vmem:[%s2004_s22 + $0x8] sm:$0xff]  ;;  %v348_v10 = vld [vmem:[%s2004_s22 + $0x10] sm:$0xff]  ;;  %748 = vst [vmem:[#allocation2 + $0x38] sm:$0x3] %v1879_v16  ;;  %1623 = vmatprep.subr.mxu1 %v1303_v18  ;;  %s1880_s23 = smov [#allocation6]  }
  0x2b   : > { %1609 = vmatprep.mubr.msk.f32.mxu0 %vm369_vm0, %v346_v3  ;;  %1599 = vmatprep.subr.mxu0 %v358_v4  ;;  %v349_v11 = vld [vmem:[%s2004_s22 + $0x18] sm:$0xff]  ;;  %v350_v12 = vld [vmem:[%s2004_s22 + $0x20] sm:$0xff]  ;;  %v351_v13 = vld [vmem:[%s2004_s22 + $0x28] sm:$0xff]  ;;  %749 = vst [vmem:[#allocation2 + $0x40] sm:$0xff] %v1879_v16 }
  0x2c   : > { %1600 = vmatpush3.msra.mxu0 %v358_v4  ;;  %v352_v14 = vld [vmem:[%s2004_s22 + $0x30] sm:$0xff]  ;;  %v353_v15 = vld [vmem:[%s2004_s22 + $0x38] sm:$0xff]  ;;  %750 = vst [vmem:[#allocation2 + $0x48] sm:$0x3] %v1879_v16  ;;  %751 = vst [vmem:[#allocation2 + $0x50] sm:$0xff] %v1879_v16  ;;  %1624 = vmatpush3.msra.mxu1 %v1303_v18  ;;  %s340_s22 = scalar_lea.vmem [#allocation6], %s1519_s21 }
  0x2d   : > { %1601 = vmatprep.subr.mxu0 %v357_v5  ;;  %752 = vst [vmem:[#allocation2 + $0x58] sm:$0x3] %v1879_v16  ;;  %753 = vst [vmem:[#allocation2 + $0x60] sm:$0xff] %v1879_v16  ;;  %1625 = vmatprep.subr.mxu1 %v1302_v19  ;;  %v1298_v23 = vld [vmem:[%s2695_s7 + $0x48] sm:$0xff]  ;;  %v1297_v24 = vld [vmem:[%s2695_s7 + $0x40] sm:$0xff]  ;;  %s1439_s28 = sshll.u32 %s340_s22, 4  ;;  %s2642_s28 = int_to_ptr.vmem [resolvable:$true] %s1439_s28 }
  0x2e   : > { %1602 = vmatpush3.msra.mxu0 %v357_v5  ;;  %754 = vst [vmem:[#allocation2 + $0x68] sm:$0x3] %v1879_v16  ;;  %755 = vst [vmem:[#allocation2 + $0x70] sm:$0xff] %v1879_v16  ;;  %1626 = vmatpush3.msra.mxu1 %v1302_v19  ;;  %v1296_v25 = vld [vmem:[%s2695_s7 + $0x38] sm:$0xff]  ;;  %v1295_v26 = vld [vmem:[%s2695_s7 + $0x30] sm:$0xff]  ;;  %s1810_s17 = scalar_lea.vmem %s2642_s28, 1024 }
  0x2f   : > { %1603 = vmatprep.subr.mxu0 %v356_v6  ;;  %756 = vst [vmem:[#allocation2 + $0x78] sm:$0x3] %v1879_v16  ;;  %757 = vst [vmem:[#allocation2 + $0x80] sm:$0xff] %v1879_v16  ;;  %1627 = vmatprep.subr.mxu1 %v1301_v20  ;;  %v1294_v27 = vld [vmem:[%s2695_s7 + $0x28] sm:$0xff]  ;;  %v1293_v28 = vld [vmem:[%s2695_s7 + $0x20] sm:$0xff]  ;;  %p1811_p6 = scmp.ne.s32.totalorder %s2642_s28, %s1810_s17  ;;  %s1814_s21 = sshll.u32 %s1880_s23, 4  ;;  %s1815_s21 = int_to_ptr.vmem [resolvable:$false] %s1814_s21 }
  0x30   : > { %1604 = vmatpush3.msra.mxu0 %v356_v6  ;;  %758 = vst [vmem:[#allocation2 + $0x88] sm:$0x3] %v1879_v16  ;;  %759 = vst [vmem:[#allocation2 + $0x90] sm:$0xff] %v1879_v16  ;;  %1628 = vmatpush3.msra.mxu1 %v1301_v20  ;;  %v1292_v29 = vld [vmem:[%s2695_s7 + $0x18] sm:$0xff]  ;;  %v1291_v30 = vld [vmem:[%s2695_s7 + $0x10] sm:$0xff]  ;;  %s1816_s25 = scalar_lea.vmem %s1815_s21, 2048  ;;  %p1817_p11 = scmp.lt.s32.totalorder %s2642_s28, %s1815_s21 }
  0x31   : > { %1605 = vmatprep.subr.mxu0 %v355_v7  ;;  %760 = vst [vmem:[#allocation2 + $0x98] sm:$0x3] %v1879_v16  ;;  %1629 = vmatprep.subr.mxu1 %v1300_v21  ;;  %v1522_v31 = vld [vmem:[%s2690_s2] ss:$0 sm:$0xff]  ;;  %v1290_v58 = vld [vmem:[%s2695_s7 + $0x8] sm:$0xff]  ;;  %p1812_p9 = pnand %p1811_p6, %p1971_p5  ;;  %p1818_p12 = scmp.lt.s32.totalorder %s1816_s25, %s1810_s17 }
  0x32   : > { %1606 = vmatpush3.msra.mxu0 %v355_v7  ;;  %1630 = vmatpush3.msra.mxu1 %v1300_v21  ;;  %v1289_v59 = vld [vmem:[%s2695_s7] sm:$0xff] }
  0x33   : > { %1607 = vmatprep.subr.mxu0 %v354_v8  ;;  %1631 = vmatprep.subr.mxu1 %v1299_v22  ;;  %v2146_v19 = vld [vmem:[#allocation3] ss:$0 sm:$0xff]  ;;  %p1813_p10 = pneg %p1812_p9  ;;  %p1819_p13 = por %p1818_p12, %p1817_p11 }
  0x34   : > { %1608 = vmatpush3.msra.mxu0 %v354_v8  ;;  %1632 = vmatpush3.msra.mxu1 %v1299_v22 }
  0x35   : > { %1610 = vmatmul.mubr.msk.f32.vlgmr.msra.gmra.mxu0 %vm369_vm0, %v347_v9  ;;  %1633 = vmatprep.subr.mxu1 %v1298_v23  ;;  %p1820_p0 = pnand %p1819_p13, %p1813_p10 }
  0x36   : > { %1612 = vmatprep.mubr.msk.f32.mxu0 %vm369_vm0, %v348_v10  ;;  %1634 = vmatpush3.msra.mxu1 %v1298_v23 }
  0x37   : > { %1635 = vmatprep.subr.mxu1 %v1297_v24 }
  0x38   : > { %1636 = vmatpush3.msra.mxu1 %v1297_v24 }
  0x39   : > { %1613 = vmatmul.mubr.msk.f32.gmra.mxu0 %vm369_vm0, %v349_v11  ;;  %1637 = vmatprep.subr.mxu1 %v1296_v25 }
  0x3a   : > { %1615 = vmatprep.mubr.msk.f32.mxu0 %vm369_vm0, %v350_v12  ;;  %1638 = vmatpush3.msra.mxu1 %v1296_v25 }
  0x3b   : > { %1639 = vmatprep.subr.mxu1 %v1295_v26 }
  0x3c   : > { %1640 = vmatpush3.msra.mxu1 %v1295_v26 }
  0x3d   : > { %1616 = vmatmul.mubr.msk.f32.gmra.mxu0 %vm369_vm0, %v351_v13  ;;  %1641 = vmatprep.subr.mxu1 %v1294_v27 }
  0x3e   : > { %1618 = vmatprep.mubr.msk.f32.mxu0 %vm369_vm0, %v352_v14  ;;  %1642 = vmatpush3.msra.mxu1 %v1294_v27 }
  0x3f   : > { %1643 = vmatprep.subr.mxu1 %v1293_v28 }
  0x40   : > { %1644 = vmatpush3.msra.mxu1 %v1293_v28 }
  0x41   : > { %1619 = vmatmul.mubr.msk.f32.gmra.mxu0 %vm369_vm0, %v353_v15  ;;  %1645 = vmatprep.subr.mxu1 %v1292_v29 }
  0x42   : > { %1646 = vmatpush3.msra.mxu1 %v1292_v29 }
  0x43   : > { %1647 = vmatprep.subr.mxu1 %v1291_v30 }
  0x44   : > { %1648 = vmatpush3.msra.mxu1 %v1291_v30  ;;  %v2153_v30 = vmul.f32 0.0, %v2146_v19 }
  0x45   : > { %1649 = vmatprep.subr.mxu1 %v1290_v58 }
  0x46   : > { %1650 = vmatpush3.msra.mxu1 %v1290_v58  ;;  %v814_v58 = vld [vmem:[#allocation2 + $0x1] sm:$0xff] }
  0x47   : > { %1651 = vmatprep.subr.mxu1 %v1289_v59 }
  0x48   : > { %1652 = vmatpush3.msra.mxu1 %v1289_v59 }
  0xf5   : > { %v1611_v32 = vpop.f32.mrf.mxu0 }
  0xf6   : > { %v2091_v33 = vadd.f32 %v1611_v32, %v1522_v31 }
  0xf7   : > { %v460_v34 = vpop.f32.mrf.mxu0 }
  0xf8   : > { %v2094_v35 = vmul.f32 0.70710677, %v2091_v33  ;;  %v2096_v36 = vadd.f32 %v1522_v31, %v460_v34 }
  0xf9   : > { %v1614_v37 = vpop.f32.mrf.mxu0 }
  0xfa   : > { %v516_v38 = vand.u32 2147483647, %v2094_v35  ;;  %v2100_v39 = vmul.f32 0.70710677, %v2096_v36  ;;  %v2102_v40 = vadd.f32 %v1614_v37, %v1522_v31  ;;  %vm676_vm1 = vcmp.ge.f32.partialorder %v2094_v35, 0.0 }
  0xfb   : > { %v470_v41 = vpop.f32.mrf.mxu0 }
  0xfc   : > { %v524_v42 = vmul.f32 0.3275911, %v516_v38  ;;  %v515_v43 = vand.u32 2147483647, %v2100_v39  ;;  %v2106_v44 = vmul.f32 0.70710677, %v2102_v40  ;;  %v2108_v45 = vadd.f32 %v1522_v31, %v470_v41 }
  0xfd   : > { %v1617_v46 = vpop.f32.mrf.mxu0  ;;  %v628_v62 = vsub.f32 0.0, %v516_v38  ;;  %vm675_vm2 = vcmp.ge.f32.partialorder %v2100_v39, 0.0 }
  0xfe   : > { %v532_v47 = vadd.f32 1.0, %v524_v42  ;;  %v523_v48 = vmul.f32 0.3275911, %v515_v43  ;;  %v518_v49 = vand.u32 2147483647, %v2106_v44  ;;  %v2115_v56 = vadd.f32 %v1617_v46, %v1522_v31 }
  0xff   : > { %v2112_v50 = vmul.f32 0.70710677, %v2108_v45  ;;  %v480_v51 = vpop.f32.mrf.mxu0  ;;  %v627_v4 = vsub.f32 0.0, %v515_v43  ;;  %v636_v6 = vmul.f32 %v628_v62, %v516_v38  ;;  %vm678_vm3 = vcmp.ge.f32.partialorder %v2106_v44, 0.0 }
 0x100   : > { %1720 = vrcp.f32 %v532_v47  ;;  %v531_v52 = vadd.f32 1.0, %v523_v48  ;;  %v526_v53 = vmul.f32 0.3275911, %v518_v49  ;;  %v2117_v57 = vadd.f32 %v1522_v31, %v480_v51 }
 0x101   : > { %v517_v54 = vand.u32 2147483647, %v2112_v50  ;;  %v1620_v55 = vpop.f32.mrf.mxu0  ;;  %v2126_v63 = vmul.f32 0.70710677, %v2115_v56  ;;  %v630_v9 = vsub.f32 0.0, %v518_v49  ;;  %v635_v13 = vmul.f32 %v627_v4, %v515_v43 }
 0x102   : > { %1722 = vrcp.f32 %v531_v52  ;;  %v534_v60 = vadd.f32 1.0, %v526_v53  ;;  %v2130_v3 = vmul.f32 0.70710677, %v2117_v57  ;;  %v2132_v5 = vadd.f32 %v1620_v55, %v1522_v31 }
 0x103   : > { %v525_v61 = vmul.f32 0.3275911, %v517_v54  ;;  %v490_v1 = vpop.f32.mrf.mxu0  ;;  %v520_v2 = vand.u32 2147483647, %v2126_v63  ;;  %v645_v16 = vmul.f32 1.442695, %v636_v6  ;;  %v638_v20 = vmul.f32 %v630_v9, %v518_v49 }
 0x104   : > { %1724 = vrcp.f32 %v534_v60  ;;  %v2134_v8 = vadd.f32 %v1522_v31, %v490_v1  ;;  %v519_v10 = vand.u32 2147483647, %v2130_v3  ;;  %v2138_v11 = vmul.f32 0.70710677, %v2132_v5  ;;  %v2171_v6 = vld [vmem:[#allocation3 + $0x1] ss:$0 sm:$0xff] }
 0x105   : > { %v533_v0 = vadd.f32 1.0, %v525_v61  ;;  %v528_v7 = vmul.f32 0.3275911, %v520_v2  ;;  %v629_v21 = vsub.f32 0.0, %v517_v54  ;;  %v643_v26 = vmul.f32 1.442695, %v635_v13 }
 0x106   : > { %v527_v14 = vmul.f32 0.3275911, %v519_v10  ;;  %v522_v15 = vand.u32 2147483647, %v2138_v11  ;;  %v2142_v17 = vmul.f32 0.70710677, %v2134_v8 }
 0x107   : > { %1726 = vrcp.f32 %v533_v0  ;;  %v536_v12 = vadd.f32 1.0, %v528_v7  ;;  %v632_v31 = vsub.f32 0.0, %v520_v2  ;;  %v649_v37 = vmul.f32 1.442695, %v638_v20 }
 0x108   : > { %v535_v22 = vadd.f32 1.0, %v527_v14  ;;  %v530_v23 = vmul.f32 0.3275911, %v522_v15  ;;  %v521_v25 = vand.u32 2147483647, %v2142_v17  ;;  %v637_v38 = vmul.f32 %v629_v21, %v517_v54 }
 0x109   : > { %1728 = vrcp.f32 %v536_v12  ;;  %v631_v43 = vsub.f32 0.0, %v519_v10  ;;  %v634_v49 = vsub.f32 0.0, %v522_v15  ;;  %v2161_v51 = vmul.f32 0.5, %v2091_v33 }
 0x10a   : > { %1730 = vrcp.f32 %v535_v22  ;;  %v538_v27 = vadd.f32 1.0, %v530_v23  ;;  %v529_v32 = vmul.f32 0.3275911, %v521_v25  ;;  %v640_v53 = vmul.f32 %v632_v31, %v520_v2 }
 0x10b   : > { %1732 = vpow2.f32 %v645_v16  ;;  %v647_v60 = vmul.f32 1.442695, %v637_v38  ;;  %v633_v61 = vsub.f32 0.0, %v521_v25  ;;  %v2168_v0 = vmul.f32 0.5, %v2096_v36 }
 0x10c   : > { %1734 = vrcp.f32 %v538_v27  ;;  %v537_v46 = vadd.f32 1.0, %v529_v32  ;;  %v639_v33 = vmul.f32 %v631_v43, %v519_v10  ;;  %v642_v7 = vmul.f32 %v634_v49, %v522_v15 }
 0x10d   : > { %v2144_v18 = vpop.eup %1720  ;;  %1736 = vpow2.f32 %v643_v26  ;;  %v2175_v12 = vmul.f32 %v2171_v6, %v814_v58  ;;  %v653_v14 = vmul.f32 1.442695, %v640_v53  ;;  %v641_v10 = vmul.f32 %v633_v61, %v521_v25 }
 0x10e   : > { %v556_v24 = vmul.f32 1.0614054, %v2144_v18  ;;  %1738 = vrcp.f32 %v537_v46  ;;  %v651_v15 = vmul.f32 1.442695, %v639_v33  ;;  %v2184_v26 = vmul.f32 0.5, %v2102_v40 }
 0x10f   : > { %v2150_v28 = vpop.eup %1722  ;;  %1740 = vpow2.f32 %v649_v37  ;;  %v655_v43 = vmul.f32 1.442695, %v641_v10  ;;  %vm677_vm4 = vcmp.ge.f32.partialorder %v2112_v50, 0.0  ;;  %v2257_v50 = vld [vmem:[%s2693_s5] ss:$0 sm:$0xff]  ;;  %vm680_vm5 = vcmp.ge.f32.partialorder %v2126_v63, 0.0 }
 0x110   : > { %v564_v29 = vadd.f32 -1.4531521, %v556_v24  ;;  %v555_v34 = vmul.f32 1.0614054, %v2150_v28  ;;  %1742 = vpow2.f32 %v647_v60  ;;  %vm679_vm6 = vcmp.ge.f32.partialorder %v2130_v3, 0.0 }
 0x111   : > { %v2156_v41 = vpop.eup %1724  ;;  %1744 = vpow2.f32 %v653_v14  ;;  %vm682_vm7 = vcmp.ge.f32.partialorder %v2138_v11, 0.0  ;;  %vm681_vm8 = vcmp.ge.f32.partialorder %v2142_v17, 0.0 }
 0x112   : > { %v572_v42 = vmul.f32 %v2144_v18, %v564_v29  ;;  %v563_v47 = vadd.f32 -1.4531521, %v555_v34  ;;  %v558_v48 = vmul.f32 1.0614054, %v2156_v41  ;;  %v657_v29 = vmul.f32 1.442695, %v642_v7 }
 0x113   : > { %1746 = vpow2.f32 %v651_v15 }
 0x114   : > { %v580_v52 = vadd.f32 1.4214138, %v572_v42  ;;  %v2163_v55 = vpop.eup %1726  ;;  %v571_v54 = vmul.f32 %v2150_v28, %v563_v47  ;;  %v566_v59 = vadd.f32 -1.4531521, %v558_v48  ;;  %1748 = vpow2.f32 %v657_v29 }
 0x115   : > { %v557_v1 = vmul.f32 1.0614054, %v2163_v55  ;;  %1750 = vpow2.f32 %v655_v43 }
 0x116   : > { %v588_v62 = vmul.f32 %v2144_v18, %v580_v52  ;;  %v579_v4 = vadd.f32 1.4214138, %v571_v54  ;;  %v574_v2 = vmul.f32 %v2156_v41, %v566_v59  ;;  %v2177_v16 = vpop.eup %1728 }
 0x117   : > { %v565_v13 = vadd.f32 -1.4531521, %v557_v1  ;;  %v560_v23 = vmul.f32 1.0614054, %v2177_v16  ;;  %v2187_v31 = vpop.eup %1730 }
 0x118   : > { %v596_v9 = vadd.f32 -0.28449672, %v588_v62  ;;  %v587_v36 = vmul.f32 %v2150_v28, %v579_v4  ;;  %v582_v20 = vadd.f32 1.4214138, %v574_v2  ;;  %v559_v42 = vmul.f32 1.0614054, %v2187_v31  ;;  %v1733_v46 = vpop.eup %1732 }
 0x119   : > { %v573_v22 = vmul.f32 %v2163_v55, %v565_v13  ;;  %v568_v37 = vadd.f32 -1.4531521, %v560_v23  ;;  %v2195_v49 = vpop.eup %1734 }
 0x11a   : > { %v604_v21 = vmul.f32 %v2144_v18, %v596_v9  ;;  %v595_v24 = vadd.f32 -0.28449672, %v587_v36  ;;  %v590_v27 = vmul.f32 %v2156_v41, %v582_v20  ;;  %v567_v54 = vadd.f32 -1.4531521, %v559_v42  ;;  %v1737_v58 = vpop.eup %1736 }
 0x11b   : > { %v581_v34 = vadd.f32 1.4214138, %v573_v22  ;;  %v576_v48 = vmul.f32 %v2177_v16, %v568_v37  ;;  %v2200_v62 = vpop.eup %1738 }
 0x11c   : > { %v612_v32 = vadd.f32 0.2548296, %v604_v21  ;;  %v603_v25 = vmul.f32 %v2150_v28, %v595_v24  ;;  %v598_v38 = vadd.f32 -0.28449672, %v590_v27  ;;  %v575_v4 = vmul.f32 %v2187_v31, %v567_v54  ;;  %v1741_v21 = vpop.eup %1740 }
 0x11d   : > { %v589_v47 = vmul.f32 %v2163_v55, %v581_v34  ;;  %v584_v61 = vadd.f32 1.4214138, %v576_v48  ;;  %v561_v10 = vmul.f32 1.0614054, %v2200_v62  ;;  %v1743_v34 = vpop.eup %1742 }
 0x11e   : > { %v620_v40 = vmul.f32 %v2144_v18, %v612_v32  ;;  %v611_v52 = vadd.f32 0.2548296, %v603_v25  ;;  %v606_v53 = vmul.f32 %v2156_v41, %v598_v38  ;;  %v562_v18 = vmul.f32 1.0614054, %v2195_v49  ;;  %v1745_v54 = vpop.eup %1744 }
 0x11f   : > { %v597_v60 = vadd.f32 -0.28449672, %v589_v47  ;;  %v592_v9 = vmul.f32 %v2177_v16, %v584_v61  ;;  %v583_v20 = vadd.f32 1.4214138, %v575_v4  ;;  %v569_v32 = vadd.f32 -1.4531521, %v561_v10 }
 0x120   : > { %v660_v59 = vmul.f32 %v1733_v46, %v620_v40  ;;  %v619_v1 = vmul.f32 %v2150_v28, %v611_v52  ;;  %v614_v33 = vadd.f32 0.2548296, %v606_v53  ;;  %v570_v13 = vadd.f32 -1.4531521, %v562_v18  ;;  %v2219_v47 = vld [vmem:[%s2691_s3] ss:$0 sm:$0xff] }
 0x121   : > { %v605_v7 = vmul.f32 %v2163_v55, %v597_v60  ;;  %v600_v23 = vadd.f32 -0.28449672, %v592_v9  ;;  %v591_v29 = vmul.f32 %v2187_v31, %v583_v20  ;;  %v577_v35 = vmul.f32 %v2200_v62, %v569_v32  ;;  %v2230_v61 = vld [vmem:[%s2691_s3 + $0x1] ss:$0 sm:$0xff] }
 0x122   : > { %v668_v2 = vsub.f32 1.0, %v660_v59  ;;  %v659_v14 = vmul.f32 %v1737_v58, %v619_v1  ;;  %v622_v36 = vmul.f32 %v2156_v41, %v614_v33  ;;  %v578_v15 = vmul.f32 %v2195_v49, %v570_v13 }
 0x123   : > { %v613_v22 = vadd.f32 0.2548296, %v605_v7  ;;  %v608_v25 = vmul.f32 %v2177_v16, %v600_v23  ;;  %v599_v40 = vadd.f32 -0.28449672, %v591_v29  ;;  %v585_v9 = vadd.f32 1.4214138, %v577_v35 }
 0x124   : > { %v684_v28 = vsub.f32 0.0, %v668_v2  ;;  %v667_v24 = vsub.f32 1.0, %v659_v14  ;;  %v662_v27 = vmul.f32 %v1741_v21, %v622_v36  ;;  %v586_v38 = vadd.f32 1.4214138, %v578_v15 }
 0x125   : > { %v621_v37 = vmul.f32 %v2163_v55, %v613_v22  ;;  %v616_v52 = vadd.f32 0.2548296, %v608_v25  ;;  %v607_v60 = vmul.f32 %v2187_v31, %v599_v40  ;;  %v593_v22 = vmul.f32 %v2200_v62, %v585_v9  ;;  %v843_v40 = vld [vmem:[#allocation2 + $0x2] sm:$0xff] }
 0x126   : > { %v692_v41 = vsel %vm676_vm1, %v668_v2, %v684_v28  ;;  %v683_v43 = vsub.f32 0.0, %v667_v24  ;;  %v670_v46 = vsub.f32 1.0, %v662_v27  ;;  %v594_v53 = vmul.f32 %v2195_v49, %v586_v38  ;;  %v1747_v2 = vpop.eup %1746 }
 0x127   : > { %v700_v42 = vadd.f32 1.0, %v692_v41  ;;  %v661_v48 = vmul.f32 %v1743_v34, %v621_v37  ;;  %v624_v33 = vmul.f32 %v2177_v16, %v616_v52  ;;  %v1749_v13 = vpop.eup %1748  ;;  %v501_v27 = vmul.f32 0.5, %v2108_v45 }
 0x128   : > { %v691_v58 = vsel %vm675_vm2, %v667_v24, %v683_v43  ;;  %v686_v59 = vsub.f32 0.0, %v670_v46  ;;  %v602_v4 = vadd.f32 -0.28449672, %v594_v53  ;;  %v1751_v23 = vpop.eup %1750  ;;  %v601_v38 = vadd.f32 -0.28449672, %v593_v22 }
 0x129   : > { %v708_v55 = vmul.f32 %v700_v42, %v2161_v51  ;;  %v699_v18 = vadd.f32 1.0, %v691_v58  ;;  %v669_v1 = vsub.f32 1.0, %v661_v48  ;;  %v615_v51 = vadd.f32 0.2548296, %v607_v60  ;;  %v2267_v48 = vld [vmem:[#allocation3 + $0x2] ss:$0 sm:$0xff] }
 0x12a   : > { %v694_v39 = vsel %vm678_vm3, %v670_v46, %v686_v59  ;;  %v664_v10 = vmul.f32 %v1745_v54, %v624_v33  ;;  %v610_v28 = vmul.f32 %v2195_v49, %v602_v4  ;;  %v609_v35 = vmul.f32 %v2200_v62, %v601_v38 }
 0x12b   : > { %v721_v7 = vmul.f32 %v2219_v47, %v708_v55  ;;  %v707_v14 = vmul.f32 %v699_v18, %v2168_v0  ;;  %v702_v36 = vadd.f32 1.0, %v694_v39  ;;  %v685_v20 = vsub.f32 0.0, %v669_v1 }
 0x12c   : > { %v623_v16 = vmul.f32 %v2187_v31, %v615_v51  ;;  %v672_v24 = vsub.f32 1.0, %v664_v10  ;;  %v504_v31 = vmul.f32 0.5, %v2115_v56  ;;  %v618_v25 = vadd.f32 0.2548296, %v610_v28 }
 0x12d   : > { %v2238_v21 = vadd.f32 %v2230_v61, %v721_v7  ;;  %v720_v44 = vmul.f32 %v2219_v47, %v707_v14  ;;  %v710_v15 = vmul.f32 %v702_v36, %v2184_v26  ;;  %v693_v0 = vsel %vm677_vm4, %v669_v1, %v685_v20  ;;  %v2294_v20 = vld [vmem:[#allocation3 + $0x3] ss:$0 sm:$0xff] }
 0x12e   : > { %v701_v29 = vadd.f32 1.0, %v693_v0  ;;  %v663_v32 = vmul.f32 %v1747_v2, %v623_v16  ;;  %v688_v37 = vsub.f32 0.0, %v672_v24  ;;  %v626_v46 = vmul.f32 %v2195_v49, %v618_v25 }
 0x12f   : > { %763 = vst [vmem:[#allocation2 + $0x21] sm:$0xff] %v2238_v21  ;;  %v2251_v34 = vadd.f32 %v2230_v61, %v720_v44  ;;  %v723_v41 = vmul.f32 %v2219_v47, %v710_v15  ;;  %v617_v60 = vadd.f32 0.2548296, %v609_v35  ;;  %v856_v18 = vmul.f32 %v2267_v48, %v843_v40 }
 0x130   : > { %v709_v26 = vmul.f32 %v701_v29, %v501_v27  ;;  %v671_v45 = vsub.f32 1.0, %v663_v32  ;;  %v696_v43 = vsel %vm680_vm5, %v672_v24, %v688_v37  ;;  %v666_v55 = vmul.f32 %v1749_v13, %v626_v46  ;;  %v2313_v32 = vld [vmem:[#allocation3 + $0x4] ss:$0 sm:$0xff] }
 0x131   : > { %762 = vst [vmem:[#allocation2 + $0x11] sm:$0xff] %v2251_v34  ;;  %v777_v56 = vadd.f32 %v2257_v50, %v2251_v34  ;;  %v2264_v42 = vadd.f32 %v2230_v61, %v723_v41  ;;  %v704_v53 = vadd.f32 1.0, %v696_v43  ;;  %v503_v33 = vmul.f32 0.5, %v2117_v57 }
 0x132   : > { %v722_v52 = vmul.f32 %v2219_v47, %v709_v26  ;;  %v687_v63 = vsub.f32 0.0, %v671_v45  ;;  %v674_v2 = vsub.f32 1.0, %v666_v55  ;;  %v506_v9 = vmul.f32 0.5, %v2132_v5 }
 0x133   : > { %v806_v54 = vadd.f32 %v2153_v30, %v777_v56  ;;  %765 = vst [vmem:[#allocation2 + $0x41] sm:$0xff] %v2264_v42  ;;  %v712_v49 = vmul.f32 %v704_v53, %v504_v31  ;;  %v625_v57 = vmul.f32 %v2200_v62, %v617_v60  ;;  %v778_v11 = vadd.f32 %v2257_v50, %v2238_v21 }
 0x134   : > { %v2275_v58 = vadd.f32 %v2230_v61, %v722_v52  ;;  %v695_v59 = vsel %vm679_vm6, %v671_v45, %v687_v63  ;;  %v690_v13 = vsub.f32 0.0, %v674_v2  ;;  %v914_v26 = vmul.f32 %v2313_v32, %v2251_v34  ;;  %v2319_v45 = vld [vmem:[#allocation3 + $0x5] ss:$0 sm:$0xff] }
 0x135   : > { %v703_v4 = vadd.f32 1.0, %v695_v59  ;;  %v835_v30 = vadd.f32 %v2175_v12, %v806_v54  ;;  %v725_v39 = vmul.f32 %v2219_v47, %v712_v49  ;;  %v829_v12 = vmul.f32 %v2171_v6, %v2238_v21  ;;  %v2328_v54 = vld [vmem:[#allocation3 + $0x6] ss:$0 sm:$0xff] }
 0x136   : > { %v2278_v1 = vld [vmem:[#allocation2 + $0x20] sm:$0xff]  ;;  %764 = vst [vmem:[#allocation2 + $0x31] sm:$0xff] %v2275_v58  ;;  %v779_v3 = vadd.f32 %v2257_v50, %v2275_v58  ;;  %v698_v5 = vsel %vm682_vm7, %v674_v2, %v690_v13  ;;  %v665_v22 = vmul.f32 %v1751_v23, %v625_v57  ;;  %v505_v55 = vmul.f32 0.5, %v2134_v8 }
 0x137   : > { %v800_v7 = vmul.f32 %v2146_v19, %v2278_v1  ;;  %v711_v51 = vmul.f32 %v703_v4, %v503_v33  ;;  %v2292_v36 = vld [vmem:[#allocation2 + $0x22] sm:$0xff]  ;;  %v2297_v10 = vadd.f32 %v2230_v61, %v725_v39  ;;  %v864_v44 = vadd.f32 %v856_v18, %v835_v30 }
 0x138   : > { %v872_v16 = vld [vmem:[#allocation2 + $0x10] sm:$0xff]  ;;  %v706_v24 = vadd.f32 1.0, %v698_v5  ;;  %v858_v29 = vmul.f32 %v2267_v48, %v2292_v36  ;;  %v673_v31 = vsub.f32 1.0, %v665_v22  ;;  %v828_v60 = vmul.f32 %v2171_v6, %v2251_v34  ;;  %v2338_v30 = vld [vmem:[#allocation3 + $0x7] ss:$0 sm:$0xff] }
 0x139   : > { %v808_v14 = vadd.f32 %v800_v7, %v779_v3  ;;  %v724_v28 = vmul.f32 %v2219_v47, %v711_v51  ;;  %v885_v62 = vmul.f32 %v2294_v20, %v872_v16  ;;  %767 = vst [vmem:[#allocation2 + $0x61] sm:$0xff] %v2297_v10  ;;  %v930_v27 = vld [vmem:[#allocation2 + $0x12] sm:$0xff]  ;;  %v799_v40 = vmul.f32 %v2146_v19, %v872_v16  ;;  %v2346_v51 = vld [vmem:[#allocation3 + $0x8] ss:$0 sm:$0xff] }
 0x13a   : > { %v2303_v0 = vld [vmem:[#allocation2 + $0x40] sm:$0xff]  ;;  %v714_v37 = vmul.f32 %v706_v24, %v506_v9  ;;  %v689_v43 = vsub.f32 0.0, %v673_v31  ;;  %v943_v46 = vmul.f32 %v2319_v45, %v930_v27  ;;  %v973_v3 = vmul.f32 %v2328_v54, %v2278_v1 }
 0x13b   : > { %v837_v15 = vadd.f32 %v829_v12, %v808_v14  ;;  %v2311_v23 = vadd.f32 %v2230_v61, %v724_v28  ;;  %v802_v41 = vmul.f32 %v2146_v19, %v2303_v0  ;;  %v893_v25 = vadd.f32 %v885_v62, %v864_v44  ;;  %v2348_v9 = vld [vmem:[#allocation2 + $0x42] sm:$0xff] }
 0x13c   : > { %v727_v63 = vmul.f32 %v2219_v47, %v714_v37  ;;  %v697_v49 = vsel %vm681_vm8, %v673_v31, %v689_v43  ;;  %v807_v59 = vadd.f32 %v799_v40, %v778_v11  ;;  %v857_v8 = vmul.f32 %v2267_v48, %v930_v27 }
 0x13d   : > { %v866_v38 = vadd.f32 %v858_v29, %v837_v15  ;;  %v874_v56 = vld [vmem:[#allocation2 + $0x30] sm:$0xff]  ;;  %766 = vst [vmem:[#allocation2 + $0x51] sm:$0xff] %v2311_v23  ;;  %v781_v53 = vadd.f32 %v2257_v50, %v2311_v23  ;;  %v922_v35 = vadd.f32 %v914_v26, %v893_v25  ;;  %v705_v4 = vadd.f32 1.0, %v697_v49 }
 0x13e   : > { %v887_v52 = vmul.f32 %v2294_v20, %v874_v56  ;;  %v2336_v33 = vadd.f32 %v2230_v61, %v727_v63  ;;  %v836_v7 = vadd.f32 %v828_v60, %v807_v59  ;;  %v831_v39 = vmul.f32 %v2171_v6, %v2264_v42  ;;  %v1019_v16 = vld [vmem:[#allocation2 + $0x32] sm:$0xff] }
 0x13f   : > { %v810_v18 = vadd.f32 %v802_v41, %v781_v53  ;;  %v951_v2 = vadd.f32 %v943_v46, %v922_v35  ;;  %v713_v34 = vmul.f32 %v705_v4, %v505_v55  ;;  %v1002_v57 = vmul.f32 %v2338_v30, %v2238_v21 }
 0x140   : > { %v895_v17 = vadd.f32 %v887_v52, %v866_v38  ;;  %769 = vst [vmem:[#allocation2 + $0x81] sm:$0xff] %v2336_v33  ;;  %v865_v14 = vadd.f32 %v857_v8, %v836_v7  ;;  %v886_v12 = vmul.f32 %v2294_v20, %v2278_v1  ;;  %v780_v28 = vadd.f32 %v2257_v50, %v2264_v42  ;;  %v2357_v62 = vld [vmem:[#allocation2 + $0x60] sm:$0xff] }
 0x141   : > { %v981_v13 = vadd.f32 %v973_v3, %v951_v2  ;;  %v839_v5 = vadd.f32 %v831_v39, %v810_v18  ;;  %v726_v22 = vmul.f32 %v2219_v47, %v713_v34  ;;  %v916_v44 = vmul.f32 %v2313_v32, %v2275_v58 }
 0x142   : > { %v1031_v24 = vmul.f32 %v2346_v51, %v2292_v36  ;;  %v894_v27 = vadd.f32 %v886_v12, %v865_v14  ;;  %v915_v1 = vmul.f32 %v2313_v32, %v2238_v21  ;;  %v860_v11 = vmul.f32 %v2267_v48, %v2348_v9  ;;  %v2405_v12 = vld [vmem:[#allocation2 + $0x62] sm:$0xff] }
 0x143   : > { %v1010_v15 = vadd.f32 %v1002_v57, %v981_v13  ;;  %v2368_v29 = vadd.f32 %v2230_v61, %v726_v22  ;;  %v924_v47 = vadd.f32 %v916_v44, %v895_v17  ;;  %v945_v31 = vmul.f32 %v2319_v45, %v1019_v16 }
 0x144   : > { %v804_v41 = vmul.f32 %v2146_v19, %v2357_v62  ;;  %v923_v25 = vadd.f32 %v915_v1, %v894_v27  ;;  %v944_v26 = vmul.f32 %v2319_v45, %v2292_v36  ;;  %v868_v38 = vadd.f32 %v860_v11, %v839_v5  ;;  %v876_v63 = vld [vmem:[#allocation2 + $0x50] sm:$0xff] }
 0x145   : > { %v2373_v37 = vadd.f32 %v1031_v24, %v1010_v15  ;;  %768 = vst [vmem:[#allocation2 + $0x71] sm:$0xff] %v2368_v29  ;;  %v953_v21 = vadd.f32 %v945_v31, %v924_v47  ;;  %v975_v61 = vmul.f32 %v2328_v54, %v2303_v0  ;;  %v801_v43 = vmul.f32 %v2146_v19, %v874_v56  ;;  %v1021_v31 = vld [vmem:[#allocation2 + $0x52] sm:$0xff] }
 0x146   : > { %v952_v40 = vadd.f32 %v944_v26, %v923_v25  ;;  %v974_v52 = vmul.f32 %v2328_v54, %v874_v56  ;;  %v1004_v53 = vmul.f32 %v2338_v30, %v2264_v42  ;;  %v783_v36 = vadd.f32 %v2257_v50, %v2368_v29 }
 0x147   : > { %v2382_v46 = vmul.f32 0.70710677, %v2373_v37  ;;  %v983_v35 = vadd.f32 %v975_v61, %v953_v21  ;;  %v809_v55 = vadd.f32 %v801_v43, %v780_v28  ;;  %v830_v49 = vmul.f32 %v2171_v6, %v2275_v58 }
 0x148   : > { %v982_v60 = vadd.f32 %v974_v52, %v952_v40  ;;  %v1003_v18 = vmul.f32 %v2338_v30, %v2275_v58  ;;  %v1033_v56 = vmul.f32 %v2346_v51, %v2348_v9  ;;  %v812_v4 = vadd.f32 %v804_v41, %v783_v36 }
 0x149   : > { %v1063_v59 = vand.u32 2147483647, %v2382_v46  ;;  %v1012_v2 = vadd.f32 %v1004_v53, %v983_v35  ;;  %v838_v3 = vadd.f32 %v830_v49, %v809_v55  ;;  %v859_v7 = vmul.f32 %v2267_v48, %v1019_v16 }
 0x14a   : > { %v889_v8 = vmul.f32 %v2294_v20, %v876_v63  ;;  %v1011_v39 = vadd.f32 %v1003_v18, %v982_v60  ;;  %v1032_v34 = vmul.f32 %v2346_v51, %v1019_v16  ;;  %v833_v13 = vmul.f32 %v2171_v6, %v2297_v10 }
 0x14b   : > { %v1071_v17 = vmul.f32 0.3275911, %v1063_v59  ;;  %v2401_v57 = vadd.f32 %v1033_v56, %v1012_v2  ;;  %v867_v58 = vadd.f32 %v859_v7, %v838_v3  ;;  %v888_v14 = vmul.f32 %v2294_v20, %v2303_v0 }
 0x14c   : > { %v2407_v5 = vadd.f32 %v1032_v34, %v1011_v39  ;;  %v917_v22 = vmul.f32 %v2313_v32, %v2264_v42  ;;  %v841_v44 = vadd.f32 %v833_v13, %v812_v4  ;;  %v1175_v15 = vsub.f32 0.0, %v1063_v59  ;;  %v2424_v25 = vld [vmem:[#allocation2 + $0x70] sm:$0xff] }
 0x14d   : > { %v1079_v28 = vadd.f32 1.0, %v1071_v17  ;;  %v2412_v16 = vmul.f32 0.70710677, %v2401_v57  ;;  %v896_v24 = vadd.f32 %v888_v14, %v867_v58  ;;  %v897_v27 = vadd.f32 %v889_v8, %v868_v38  ;;  %v996_v17 = vld [vmem:[#allocation2 + $0x91] sm:$0xff] }
 0x14e   : > { %v2415_v1 = vmul.f32 0.70710677, %v2407_v5  ;;  %v862_v0 = vmul.f32 %v2267_v48, %v2405_v12  ;;  %v946_v42 = vmul.f32 %v2319_v45, %v2348_v9  ;;  %v782_v41 = vadd.f32 %v2257_v50, %v2297_v10 }
 0x14f   : > { %1752 = vrcp.f32 %v1079_v28  ;;  %v1065_v11 = vand.u32 2147483647, %v2412_v16  ;;  %v925_v47 = vadd.f32 %v917_v22, %v896_v24  ;;  %v976_v38 = vmul.f32 %v2328_v54, %v876_v63 }
 0x150   : > { %v1064_v26 = vand.u32 2147483647, %v2415_v1  ;;  %v918_v21 = vmul.f32 %v2313_v32, %v2311_v23  ;;  %v870_v61 = vadd.f32 %v862_v0, %v841_v44  ;;  %v1183_v43 = vmul.f32 %v1175_v15, %v1063_v59  ;;  %v1025_v44 = vld [vmem:[#allocation2 + $0x92] sm:$0xff] }
 0x151   : > { %v1073_v40 = vmul.f32 0.3275911, %v1065_v11  ;;  %v954_v52 = vadd.f32 %v946_v42, %v925_v47  ;;  %v1005_v9 = vmul.f32 %v2338_v30, %v2311_v23  ;;  %v947_v35 = vmul.f32 %v2319_v45, %v1021_v31 }
 0x152   : > { %v1072_v53 = vmul.f32 0.3275911, %v1064_v26  ;;  %v926_v36 = vadd.f32 %v918_v21, %v897_v27  ;;  %v891_v55 = vmul.f32 %v2294_v20, %v2424_v25  ;;  %v1034_v18 = vmul.f32 %v2346_v51, %v1021_v31  ;;  %v2459_v21 = vld [vmem:[#allocation2 + $0x72] sm:$0xff] }
 0x153   : > { %v1081_v49 = vadd.f32 1.0, %v1073_v40  ;;  %v984_v60 = vadd.f32 %v976_v38, %v954_v52  ;;  %v1177_v4 = vsub.f32 0.0, %v1065_v11  ;;  %v977_v59 = vmul.f32 %v2328_v54, %v2357_v62 }
 0x154   : > { %v1080_v56 = vadd.f32 1.0, %v1072_v53  ;;  %v955_v2 = vadd.f32 %v947_v35, %v926_v36  ;;  %v1191_v3 = vmul.f32 1.442695, %v1183_v43  ;;  %v803_v8 = vmul.f32 %v2146_v19, %v876_v63  ;;  %v2471_v53 = vld [vmem:[#allocation2 + $0x80] sm:$0xff] }
 0x155   : > { %1754 = vrcp.f32 %v1081_v49  ;;  %v1013_v7 = vadd.f32 %v1005_v9, %v984_v60  ;;  %v1176_v39 = vsub.f32 0.0, %v1064_v26  ;;  %v1006_v13 = vmul.f32 %v2338_v30, %v2297_v10 }
 0x156   : > { %1756 = vrcp.f32 %v1080_v56  ;;  %v985_v34 = vadd.f32 %v977_v59, %v955_v2  ;;  %v811_v14 = vadd.f32 %v803_v8, %v782_v41  ;;  %v832_v28 = vmul.f32 %v2171_v6, %v2311_v23 }
 0x157   : > { %v2441_v58 = vadd.f32 %v1034_v18, %v1013_v7  ;;  %v2446_v22 = vmul.f32 0.0, %v2328_v54  ;;  %v1185_v15 = vmul.f32 %v1177_v4, %v1065_v11  ;;  %v1035_v63 = vmul.f32 %v2346_v51, %v2405_v12 }
 0x158   : > { %v1014_v24 = vadd.f32 %v1006_v13, %v985_v34  ;;  %v2451_v27 = vmul.f32 %v2338_v30, %v996_v17  ;;  %v899_v0 = vadd.f32 %v891_v55, %v870_v61  ;;  %v840_v42 = vadd.f32 %v832_v28, %v811_v14  ;;  %v2489_v13 = vld [vmem:[#allocation2 + $0x82] sm:$0xff] }
 0x159   : > { %v2454_v47 = vmul.f32 0.70710677, %v2441_v58  ;;  %v861_v41 = vmul.f32 %v2267_v48, %v1021_v31  ;;  %1758 = vpow2.f32 %v1191_v3  ;;  %v1184_v23 = vmul.f32 %v1176_v39, %v1064_v26 }
 0x15a   : > { %v2457_v38 = vadd.f32 %v1035_v63, %v1014_v24  ;;  %v2462_v11 = vmul.f32 %v2346_v51, %v1025_v44  ;;  %v890_v52 = vmul.f32 %v2294_v20, %v2357_v62  ;;  %v920_v31 = vmul.f32 %v2313_v32, %v2368_v29 }
 0x15b   : > { %v1066_v40 = vand.u32 2147483647, %v2454_v47  ;;  %v869_v61 = vadd.f32 %v861_v41, %v840_v42  ;;  %v1195_v9 = vmul.f32 1.442695, %v1185_v15  ;;  %v919_v35 = vmul.f32 %v2313_v32, %v2297_v10 }
 0x15c   : > { %v2464_v43 = vpop.eup %1752  ;;  %v2475_v36 = vmul.f32 0.70710677, %v2457_v38  ;;  %v928_v60 = vadd.f32 %v920_v31, %v899_v0  ;;  %v949_v62 = vmul.f32 %v2319_v45, %v2459_v21  ;;  %v1193_v56 = vmul.f32 1.442695, %v1184_v23 }
 0x15d   : > { %v1103_v26 = vmul.f32 1.0614054, %v2464_v43  ;;  %v1074_v55 = vmul.f32 0.3275911, %v1066_v40  ;;  %v898_v49 = vadd.f32 %v890_v52, %v869_v61  ;;  %v948_v2 = vmul.f32 %v2319_v45, %v2405_v12 }
 0x15e   : > { %v1067_v4 = vand.u32 2147483647, %v2475_v36  ;;  %v957_v7 = vadd.f32 %v949_v62, %v928_v60  ;;  %v979_v8 = vmul.f32 %v2328_v54, %v2471_v53  ;;  %v1178_v17 = vsub.f32 0.0, %v1066_v40 }
 0x15f   : > { %v1111_v18 = vadd.f32 -1.4531521, %v1103_v26  ;;  %v1082_v59 = vadd.f32 1.0, %v1074_v55  ;;  %v927_v3 = vadd.f32 %v919_v35, %v898_v49  ;;  %v978_v34 = vmul.f32 %v2328_v54, %v2424_v25 }
 0x160   : > { %v1075_v39 = vmul.f32 0.3275911, %v1067_v4  ;;  %v987_v28 = vadd.f32 %v979_v8, %v957_v7  ;;  %v1008_v12 = vmul.f32 %v2338_v30, %v2336_v33  ;;  %v1007_v63 = vmul.f32 %v2338_v30, %v2368_v29 }
 0x161   : > { %v1119_v10 = vmul.f32 %v2464_v43, %v1111_v18  ;;  %1760 = vrcp.f32 %v1082_v59  ;;  %v956_v14 = vadd.f32 %v948_v2, %v927_v3  ;;  %v1036_v0 = vmul.f32 %v2346_v51, %v2459_v21 }
 0x162   : > { %v2493_v44 = vpop.eup %1754  ;;  %v1083_v24 = vadd.f32 1.0, %v1075_v39  ;;  %v1016_v23 = vadd.f32 %v1008_v12, %v987_v28  ;;  %v1037_v61 = vmul.f32 %v2346_v51, %v2489_v13  ;;  %v1186_v26 = vmul.f32 %v1178_v17, %v1066_v40 }
 0x163   : > { %v1127_v15 = vadd.f32 1.4214138, %v1119_v10  ;;  %v2499_v42 = vpop.eup %1756  ;;  %v1105_v54 = vmul.f32 1.0614054, %v2493_v44  ;;  %v986_v41 = vadd.f32 %v978_v34, %v956_v14  ;;  %v805_v49 = vmul.f32 %v2146_v19, %v2424_v25 }
 0x164   : > { %v1104_v31 = vmul.f32 1.0614054, %v2499_v42  ;;  %1762 = vrcp.f32 %v1083_v24  ;;  %v2506_v55 = vadd.f32 %v1037_v61, %v1016_v23  ;;  %v784_v60 = vadd.f32 %v2257_v50, %v2336_v33 }
 0x165   : > { %v1135_v52 = vmul.f32 %v2464_v43, %v1127_v15  ;;  %v1113_v35 = vadd.f32 -1.4531521, %v1105_v54  ;;  %v1015_v30 = vadd.f32 %v1007_v63, %v986_v41  ;;  %v1179_v2 = vsub.f32 0.0, %v1067_v4 }
 0x166   : > { %v1112_v18 = vadd.f32 -1.4531521, %v1104_v31  ;;  %v1759_v51 = vpop.eup %1758  ;;  %1764 = vpow2.f32 %v1195_v9  ;;  %v2516_v40 = vmul.f32 0.70710677, %v2506_v55  ;;  %v813_v19 = vadd.f32 %v805_v49, %v784_v60 }
 0x167   : > { %v1143_v62 = vadd.f32 -0.28449672, %v1135_v52  ;;  %v1121_v59 = vmul.f32 %v2493_v44, %v1113_v35  ;;  %v2513_v3 = vadd.f32 %v1036_v0, %v1015_v30  ;;  %1766 = vpow2.f32 %v1193_v56 }
 0x168   : > { %v1120_v8 = vmul.f32 %v2499_v42, %v1112_v18  ;;  %v1197_v50 = vmul.f32 1.442695, %v1186_v26  ;;  %v834_v17 = vmul.f32 %v2171_v6, %v2368_v29  ;;  %v1187_v34 = vmul.f32 %v1179_v2, %v1067_v4 }
 0x169   : > { %v1151_v7 = vmul.f32 %v2464_v43, %v1143_v62  ;;  %v1129_v25 = vadd.f32 1.4214138, %v1121_v59  ;;  %v2521_v10 = vmul.f32 0.70710677, %v2513_v3  ;;  %v1069_v14 = vand.u32 2147483647, %v2516_v40 }
 0x16a   : > { %v1128_v39 = vadd.f32 1.4214138, %v1120_v8  ;;  %v1047_v28 = vmul.f32 0.5, %v2373_v37  ;;  %v842_v15 = vadd.f32 %v834_v17, %v813_v19  ;;  %vm1223_vm9 = vcmp.ge.f32.partialorder %v2382_v46, 0.0 }
 0x16b   : > { %v1159_v9 = vadd.f32 0.2548296, %v1151_v7  ;;  %v1137_v12 = vmul.f32 %v2493_v44, %v1129_v25  ;;  %v2529_v56 = vand.u32 2147483647, %v2521_v10  ;;  %v1077_v6 = vmul.f32 0.3275911, %v1069_v14 }
 0x16c   : > { %v1136_v63 = vmul.f32 %v2499_v42, %v1128_v39  ;;  %1768 = vpow2.f32 %v1197_v50  ;;  %v863_v37 = vmul.f32 %v2267_v48, %v2459_v21  ;;  %v1199_v23 = vmul.f32 1.442695, %v1187_v34 }
 0x16d   : > { %v1167_v24 = vmul.f32 %v2464_v43, %v1159_v9  ;;  %v1145_v29 = vadd.f32 -0.28449672, %v1137_v12  ;;  %v1076_v4 = vmul.f32 0.3275911, %v2529_v56  ;;  %v1085_v61 = vadd.f32 1.0, %v1077_v6 }
 0x16e   : > { %v2537_v0 = vpop.eup %1760  ;;  %v1144_v41 = vadd.f32 -0.28449672, %v1136_v63  ;;  %v871_v26 = vadd.f32 %v863_v37, %v842_v15  ;;  %v2543_v49 = vmul.f32 0.5, %v2401_v57  ;;  %v892_v62 = vmul.f32 %v2294_v20, %v2471_v53  ;;  %v2561_v12 = vld [vmem:[%s2694_s6] ss:$0 sm:$0xff] }
 0x16f   : > { %v1207_v54 = vmul.f32 %v1759_v51, %v1167_v24  ;;  %v1153_v43 = vmul.f32 %v2493_v44, %v1145_v29  ;;  %v1106_v52 = vmul.f32 1.0614054, %v2537_v0  ;;  %v1084_v31 = vadd.f32 1.0, %v1076_v4  ;;  %v2570_v29 = vld [vmem:[%s2694_s6 + $0x1] ss:$0 sm:$0xff] }
 0x170   : > { %v1152_v30 = vmul.f32 %v2499_v42, %v1144_v41  ;;  %1770 = vrcp.f32 %v1085_v61  ;;  %v1181_v57 = vsub.f32 0.0, %v1069_v14  ;;  %v900_v8 = vadd.f32 %v892_v62, %v871_v26 }
 0x171   : > { %v1215_v35 = vsub.f32 1.0, %v1207_v54  ;;  %v2545_v48 = vpop.eup %1762  ;;  %v1161_v21 = vadd.f32 0.2548296, %v1153_v43  ;;  %v1114_v60 = vadd.f32 -1.4531521, %v1106_v52  ;;  %1772 = vrcp.f32 %v1084_v31 }
 0x172   : > { %v1160_v2 = vadd.f32 0.2548296, %v1152_v30  ;;  %v1107_v51 = vmul.f32 1.0614054, %v2545_v48  ;;  %1774 = vpow2.f32 %v1199_v23  ;;  %v921_v20 = vmul.f32 %v2313_v32, %v2336_v33 }
 0x173   : > { %v1231_v18 = vsub.f32 0.0, %v1215_v35  ;;  %v1169_v59 = vmul.f32 %v2493_v44, %v1161_v21  ;;  %v1122_v7 = vmul.f32 %v2537_v0, %v1114_v60  ;;  %v1765_v19 = vpop.eup %1764  ;;  %v1180_v44 = vsub.f32 0.0, %v2529_v56 }
 0x174   : > { %v1168_v50 = vmul.f32 %v2499_v42, %v1160_v2  ;;  %v1115_v17 = vadd.f32 -1.4531521, %v1107_v51  ;;  %v1767_v53 = vpop.eup %1766  ;;  %v929_v24 = vadd.f32 %v921_v20, %v900_v8  ;;  %v950_v42 = vmul.f32 %v2319_v45, %v2489_v13 }
 0x175   : > { %v1239_v25 = vsel %vm1223_vm9, %v1215_v35, %v1231_v18  ;;  %v1209_v39 = vmul.f32 %v1765_v19, %v1169_v59  ;;  %v1130_v34 = vadd.f32 1.4214138, %v1122_v7  ;;  %v1189_v6 = vmul.f32 %v1181_v57, %v1069_v14 }
 0x176   : > { %v1247_v9 = vadd.f32 1.0, %v1239_v25  ;;  %v1208_v15 = vmul.f32 %v1767_v53, %v1168_v50  ;;  %v1123_v46 = vmul.f32 %v2545_v48, %v1115_v17  ;;  %vm1225_vm10 = vcmp.ge.f32.partialorder %v2412_v16, 0.0 }
 0x177   : > { %v1217_v32 = vsub.f32 1.0, %v1209_v39  ;;  %v1138_v33 = vmul.f32 %v2537_v0, %v1130_v34  ;;  %v958_v54 = vadd.f32 %v950_v42, %v929_v24  ;;  %v1188_v45 = vmul.f32 %v1180_v44, %v2529_v56 }
 0x178   : > { %v1255_v63 = vmul.f32 %v1247_v9, %v1047_v28  ;;  %v1216_v4 = vsub.f32 1.0, %v1208_v15  ;;  %v1131_v37 = vadd.f32 1.4214138, %v1123_v46  ;;  %vm1224_vm11 = vcmp.ge.f32.partialorder %v2415_v1, 0.0 }
 0x179   : > { %v1233_v23 = vsub.f32 0.0, %v1217_v32  ;;  %v1146_v61 = vadd.f32 -0.28449672, %v1138_v33  ;;  %v1769_v13 = vpop.eup %1768  ;;  %v988_v43 = vadd.f32 %v2446_v22, %v958_v54  ;;  %v1203_v26 = vmul.f32 1.442695, %v1189_v6 }
 0x17a   : > { %v1268_v41 = vmul.f32 %v2561_v12, %v1255_v63  ;;  %v1232_v14 = vsub.f32 0.0, %v1216_v4  ;;  %v1139_v28 = vmul.f32 %v2545_v48, %v1131_v37  ;;  %v1048_v1 = vmul.f32 0.5, %v2407_v5 }
 0x17b   : > { %v1241_v31 = vsel %vm1225_vm10, %v1217_v32, %v1233_v23  ;;  %v1154_v16 = vmul.f32 %v2537_v0, %v1146_v61  ;;  %v1017_v60 = vadd.f32 %v2451_v27, %v988_v43  ;;  %v1201_v2 = vmul.f32 1.442695, %v1188_v45 }
 0x17c   : > { %v1281_v52 = vadd.f32 %v2570_v29, %v1268_v41  ;;  %v1240_v35 = vsel %vm1224_vm11, %v1216_v4, %v1232_v14  ;;  %v1249_v30 = vadd.f32 1.0, %v1241_v31  ;;  %v1147_v21 = vadd.f32 -0.28449672, %v1139_v28 }
 0x17d   : > { %v2581_v56 = vpop.eup %1770  ;;  %v1248_v62 = vadd.f32 1.0, %v1240_v35  ;;  %v1162_v18 = vadd.f32 0.2548296, %v1154_v16  ;;  %v2588_v57 = vadd.f32 %v2462_v11, %v1017_v60  ;;  %1776 = vpow2.f32 %v1203_v26 }
 0x17e   : > { %1653 = vmatprep.mubr.f32.mxu1 %v1281_v52  ;;  %v1773_v22 = vpop.eup %1772  ;;  %v1257_v51 = vmul.f32 %v1249_v30, %v2543_v49  ;;  %v1155_v59 = vmul.f32 %v2545_v48, %v1147_v21  ;;  %v1109_v7 = vmul.f32 1.0614054, %v2581_v56  ;;  %1778 = vpow2.f32 %v1201_v2 }
 0x17f   : > { %v1775_v8 = vpop.eup %1774  ;;  %v1256_v27 = vmul.f32 %v1248_v62, %v1048_v1  ;;  %v1170_v19 = vmul.f32 %v2537_v0, %v1162_v18  ;;  %v1108_v25 = vmul.f32 1.0614054, %v1773_v22  ;;  %v2594_v9 = vmul.f32 0.70710677, %v2588_v57 }
 0x180   : > { %v1270_v5 = vmul.f32 %v2561_v12, %v1257_v51  ;;  %v1163_v50 = vadd.f32 0.2548296, %v1155_v59  ;;  %v1117_v17 = vadd.f32 -1.4531521, %v1109_v7  ;;  %vm1226_vm12 = vcmp.ge.f32.partialorder %v2454_v47, 0.0 }
 0x181   : > { %v1269_v20 = vmul.f32 %v2561_v12, %v1256_v27  ;;  %v1210_v49 = vmul.f32 %v1769_v13, %v1170_v19  ;;  %v1116_v53 = vadd.f32 -1.4531521, %v1108_v25  ;;  %v1070_v15 = vand.u32 2147483647, %v2594_v9 }
 0x182   : > { %v1171_v11 = vmul.f32 %v2545_v48, %v1163_v50  ;;  %v1125_v39 = vmul.f32 %v2581_v56, %v1117_v17  ;;  %v1283_v46 = vadd.f32 %v2570_v29, %v1270_v5  ;;  %v1050_v41 = vmul.f32 0.5, %v2441_v58 }
 0x183   : > { %v1282_v0 = vadd.f32 %v2570_v29, %v1269_v20  ;;  %v1218_v34 = vsub.f32 1.0, %v1210_v49  ;;  %v1124_v44 = vmul.f32 %v1773_v22, %v1116_v53  ;;  %v1078_v33 = vmul.f32 0.3275911, %v1070_v15 }
 0x184   : > { %v1211_v24 = vmul.f32 %v1775_v8, %v1171_v11  ;;  %v1133_v42 = vadd.f32 1.4214138, %v1125_v39  ;;  %vm1227_vm13 = vcmp.ge.f32.partialorder %v2475_v36, 0.0  ;;  %v1051_v47 = vmul.f32 0.5, %v2457_v38 }
 0x185   : > { %1654 = vmatmul.mubr.f32.vlgmr.msra.gmra.mxu1 %v1282_v0  ;;  %v1234_v63 = vsub.f32 0.0, %v1218_v34  ;;  %v1132_v32 = vadd.f32 1.4214138, %v1124_v44  ;;  %v1086_v54 = vadd.f32 1.0, %v1078_v33  ;;  %v1182_v18 = vsub.f32 0.0, %v1070_v15 }
 0x186   : > { %1656 = vmatprep.mubr.f32.mxu1 %v1283_v46  ;;  %v1219_v48 = vsub.f32 1.0, %v1211_v24  ;;  %v1141_v6 = vmul.f32 %v2581_v56, %v1133_v42  ;;  %vm1229_vm14 = vcmp.ge.f32.partialorder %v2516_v40, 0.0  ;;  %vm1228_vm15 = vcmp.ge.f32.partialorder %v2521_v10, 0.0 }
 0x187   : > { %v1242_v4 = vsel %vm1226_vm12, %v1218_v34, %v1234_v63  ;;  %v1140_v37 = vmul.f32 %v1773_v22, %v1132_v32  ;;  %1780 = vrcp.f32 %v1086_v54  ;;  %v1190_v8 = vmul.f32 %v1182_v18, %v1070_v15 }
 0x188   : > { %v1250_v23 = vadd.f32 1.0, %v1242_v4  ;;  %v1235_v61 = vsub.f32 0.0, %v1219_v48  ;;  %v1149_v45 = vadd.f32 -0.28449672, %v1141_v6  ;;  %v1052_v49 = vmul.f32 0.5, %v2513_v3 }
 0x189   : > { %v1148_v13 = vadd.f32 -0.28449672, %v1140_v37  ;;  %v1205_v20 = vmul.f32 1.442695, %v1190_v8  ;;  %vm1230_vm1 = vcmp.ge.f32.partialorder %v2594_v9, 0.0  ;;  %v1054_v37 = vmul.f32 0.5, %v2588_v57 }
 0x18a   : > { %v1258_v14 = vmul.f32 %v1250_v23, %v1050_v41  ;;  %v1243_v28 = vsel %vm1227_vm13, %v1219_v48, %v1235_v61  ;;  %v1157_v43 = vmul.f32 %v2581_v56, %v1149_v45  ;;  %v1777_v35 = vpop.eup %1776  ;;  %v1545_v45 = vld [vmem:[%s2696_s8] ss:$0 sm:$0xff] }
 0x18b   : > { %v1251_v52 = vadd.f32 1.0, %v1243_v28  ;;  %v1156_v31 = vmul.f32 %v1773_v22, %v1148_v13  ;;  %v1779_v60 = vpop.eup %1778  ;;  %1782 = vpow2.f32 %v1205_v20 }
 0x18c   : > { %v1271_v16 = vmul.f32 %v2561_v12, %v1258_v14  ;;  %v1165_v26 = vadd.f32 0.2548296, %v1157_v43 }
 0x18d   : > { %v1259_v58 = vmul.f32 %v1251_v52, %v1051_v47  ;;  %v1164_v30 = vadd.f32 0.2548296, %v1156_v31 }
 0x18e   : > { %v1284_v21 = vadd.f32 %v2570_v29, %v1271_v16  ;;  %v1173_v36 = vmul.f32 %v2581_v56, %v1165_v26  ;;  %v1053_v56 = vmul.f32 0.5, %v2506_v55 }
 0x18f   : > { %v1272_v1 = vmul.f32 %v2561_v12, %v1259_v58  ;;  %v1172_v62 = vmul.f32 %v1773_v22, %v1164_v30 }
 0x190   : > { %1657 = vmatmul.mubr.f32.gmra.mxu1 %v1284_v21  ;;  %v1213_v2 = vmul.f32 %v1777_v35, %v1173_v36 }
 0x191   : > { %v1285_v38 = vadd.f32 %v2570_v29, %v1272_v1  ;;  %v1212_v51 = vmul.f32 %v1779_v60, %v1172_v62 }
 0x192   : > { %v1221_v59 = vsub.f32 1.0, %v1213_v2 }
 0x193   : > { %1659 = vmatprep.mubr.f32.mxu1 %v1285_v38  ;;  %v1220_v7 = vsub.f32 1.0, %v1212_v51 }
 0x194   : > { %v1237_v27 = vsub.f32 0.0, %v1221_v59  ;;  %v1781_v25 = vpop.eup %1780 }
 0x195   : > { %v1236_v19 = vsub.f32 0.0, %v1220_v7  ;;  %v1110_v17 = vmul.f32 1.0614054, %v1781_v25 }
 0x196   : > { %v1245_v22 = vsel %vm1229_vm14, %v1221_v59, %v1237_v27 }
 0x197   : > { %v1244_v5 = vsel %vm1228_vm15, %v1220_v7, %v1236_v19  ;;  %v1253_v50 = vadd.f32 1.0, %v1245_v22  ;;  %v1118_v39 = vadd.f32 -1.4531521, %v1110_v17 }
 0x198   : > { %v1252_v53 = vadd.f32 1.0, %v1244_v5  ;;  %v1783_v32 = vpop.eup %1782 }
 0x199   : > { %v1261_v11 = vmul.f32 %v1253_v50, %v1053_v56  ;;  %v1126_v44 = vmul.f32 %v1781_v25, %v1118_v39 }
 0x19a   : > { %v1260_v0 = vmul.f32 %v1252_v53, %v1052_v49 }
 0x19b   : > { %v1274_v34 = vmul.f32 %v2561_v12, %v1261_v11  ;;  %v1134_v10 = vadd.f32 1.4214138, %v1126_v44 }
 0x19c   : > { %v1273_v40 = vmul.f32 %v2561_v12, %v1260_v0 }
 0x19d   : > { %v1287_v15 = vadd.f32 %v2570_v29, %v1274_v34  ;;  %v1142_v46 = vmul.f32 %v1781_v25, %v1134_v10 }
 0x19e   : > { %v1286_v55 = vadd.f32 %v2570_v29, %v1273_v40 }
 0x19f   : > { %v1150_v24 = vadd.f32 -0.28449672, %v1142_v46 }
 0x1a0   : > { %1660 = vmatmul.mubr.f32.gmra.mxu1 %v1286_v55 }
 0x1a1   : > { %1662 = vmatprep.mubr.f32.mxu1 %v1287_v15  ;;  %v1158_v3 = vmul.f32 %v1781_v25, %v1150_v24 }
 0x1a3   : > { %v1166_v42 = vadd.f32 0.2548296, %v1158_v3 }
 0x1a5   : > { %v1174_v63 = vmul.f32 %v1781_v25, %v1166_v42 }
 0x1a7   : > { %v1214_v33 = vmul.f32 %v1783_v32, %v1174_v63 }
 0x1a9   : > { %v1222_v48 = vsub.f32 1.0, %v1214_v33 }
 0x1ab   : > { %v1238_v6 = vsub.f32 0.0, %v1222_v48 }
 0x1ad   : > { %v1246_v4 = vsel %vm1230_vm1, %v1222_v48, %v1238_v6 }
 0x1ae   : > { %v1254_v54 = vadd.f32 1.0, %v1246_v4 }
 0x1b0   : > { %v1262_v41 = vmul.f32 %v1254_v54, %v1054_v37 }
 0x1b2   : > { %v1275_v23 = vmul.f32 %v2561_v12, %v1262_v41 }
 0x1b4   : > { %v1288_v61 = vadd.f32 %v2570_v29, %v1275_v23 }
 0x1b6   : > { %1663 = vmatmul.mubr.f32.gmra.mxu1 %v1288_v61 }
 0x245   : > { %v1655_v13 = vpop.f32.mrf.mxu1 }
 0x246   : > { %v1384_v14 = vadd.f32 %v1655_v13, %v1545_v45 }
 0x247   : > { %v1378_v9 = vpop.f32.mrf.mxu1 }
 0x248   : > { %1418 = vst.msk [vmem:[%s340_s22 + $0x8] sm:$0xff] %vm369_vm0, %v1384_v14  ;;  %v1379_v57 = vadd.f32 %v1545_v45, %v1378_v9 }
 0x24a   : > { %1417 = vst.msk [vmem:[%s340_s22] sm:$0xff] %vm369_vm0, %v1379_v57 }
 0x250   : > { %v1658_v12 = vpop.f32.mrf.mxu1 }
 0x251   : > { %v1394_v29 = vadd.f32 %v1658_v12, %v1545_v45 }
 0x252   : > { %v1388_v28 = vpop.f32.mrf.mxu1 }
 0x253   : > { %1420 = vst.msk [vmem:[%s340_s22 + $0x18] sm:$0xff] %vm369_vm0, %v1394_v29  ;;  %v1389_v43 = vadd.f32 %v1545_v45, %v1388_v28 }
 0x255   : > { %1419 = vst.msk [vmem:[%s340_s22 + $0x10] sm:$0xff] %vm369_vm0, %v1389_v43 }
 0x260   : > { %v1661_v47 = vpop.f32.mrf.mxu1 }
 0x261   : > { %v1404_v52 = vadd.f32 %v1661_v47, %v1545_v45 }
 0x262   : > { %v1398_v31 = vpop.f32.mrf.mxu1 }
 0x263   : > { %1422 = vst.msk [vmem:[%s340_s22 + $0x28] sm:$0xff] %vm369_vm0, %v1404_v52  ;;  %v1399_v16 = vadd.f32 %v1545_v45, %v1398_v31 }
 0x265   : > { %1421 = vst.msk [vmem:[%s340_s22 + $0x20] sm:$0xff] %vm369_vm0, %v1399_v16 }
 0x276   : > { %v1664_v26 = vpop.f32.mrf.mxu1 }
 0x277   : > { %v1414_v35 = vadd.f32 %v1664_v26, %v1545_v45 }
 0x278   : > { %v1408_v58 = vpop.f32.mrf.mxu1 }
 0x279   : > { %1424 = vst.msk [vmem:[%s340_s22 + $0x38] sm:$0xff] %vm369_vm0, %v1414_v35  ;;  %v1409_v30 = vadd.f32 %v1545_v45, %v1408_v58 }
 0x27b   : > { %1423 = vst.msk [vmem:[%s340_s22 + $0x30] sm:$0xff] %vm369_vm0, %v1409_v30 }
 0x27c   : > { %1823 = shalt.err (!%p1820_p0)
}
 0x27d   : > { %s1824_s24 = scalar_lea.hbm %s2640_s16, 1024  ;;  %s1828_s27 = scalar_lea.hbm %s2697_s9, 2048 }
 0x27e   : > { %p1825_p1 = scmp.ne.s32.totalorder %s2640_s16, %s1824_s24  ;;  %p1829_p4 = scmp.lt.s32.totalorder %s2640_s16, %s2697_s9 }
 0x27f   : > { %p1830_p7 = scmp.lt.s32.totalorder %s1828_s27, %s1824_s24 }
 0x280   : > { %p1826_p2 = pnand %p1825_p1, %p1971_p5 }
 0x281   : > { %p1831_p8 = por %p1830_p7, %p1829_p4 }
 0x282   : > { %p1827_p3 = pneg %p1826_p2 }
 0x284   : > { %p1832_p6 = pnand %p1831_p8, %p1827_p3 }
 0x286   : > { %1835 = shalt.err (!%p1832_p6)
}
 0x287   : > { %s1881_s17 = smov 128   ;;  %s1882_s23 = smov 8  }
 0x288   : > { %1669 = dma.vmem_to_hbm [thread:$0]  (%p1971_p5), %s2642_s28, 1024, %s2640_s16, %s2648_s13, %s1881_s17, %s1881_s17, %s1882_s23  }
 0x289 PF: > { %p1681_p9 = scmp.ge.s32.totalorder %s1874_s12, 2  ;;  %s1454_s21 = sand.u32 1, %s1862_s30  }
 0x28a   : > { %p2701_p10 = scmp.ne.s32.totalorder %s2699_s20, 0  ;;  %s1455_s25 = scalar_lea.sflag [#allocation5], %s1454_s21 }
 0x28c   : > { %p1676_p11 = pnand %p1681_p9, %p2701_p10 }
 0x28e   : > { %p1677_p12 = pneg %p1676_p11 }
 0x290   : > { %1857 = dma.done.wait (%p1677_p12), %s1455_s25, 1024  }
 0x291   : > { %1859 = vsyncadd (%p1677_p12), %s1455_s25, 4294966272  ;;  %p20_p13 = scmp.ge.s32.totalorder %s1958_s15, 4   ;;  %s2702_s30 = smov %s1866_s10 }
 0x292   : > { %s2703_s10 = smov %s1870_s11  ;;  %s2704_s11 = smov %s1969_s18 }
 0x293   : > { %s2705_s12 = smov %s1958_s15  ;;  %22 = sbr.rel (!%p20_p13) target bundleno = 4 (0x4), region = 98 }
 0x298   :  { %1460 = vsyncpa [#allocation4], 1 }
 0x299   :  { %1462 = vsyncpa [#allocation4 + $0x1], 1 }
 0x29a   :  { %1463 = vsyncpa [#allocation5], 1 }
 0x29b   :  { %1465 = vsyncpa [#allocation5 + $0x1], 1 }

</bundles_post_ra>
